<compile_context>
chip_gen: v5e
topology: v5e:2x2
jax: 0.10.0
libtpu: 0.0.40
codegen_flags: <defaults>
</compile_context>

<pallas_src>
import functools

import numpy as np
import jax
import jax.numpy as jnp
from jax.experimental import pallas as pl
from jax.experimental.pallas import tpu as pltpu


C_IN = 32      # FPN output channels
C_MID = 16     # seg_head hidden channels
C_OUT = 4      # seg_head output channels
HALO = 6       # total row/col halo of the fused conv stack (dilation 2 + dilation 4)
_SL = 4        # lane slack so shifted tap slices stay in-bounds (max |col shift| = 4)


# ----------------------------------------------------------------------------- kernel

def _seg_head_kernel(*refs, W, TH, nT):
    """Fused seg_head on one (batch, row-tile) block.

    All activations are channel-major: (C, rows*W) with the flattened spatial dim on the
    128-lane axis.  x_ext / h1_ext are row-extended VMEM buffers with `_SL` lanes of slack
    on each side so every shifted tap slice is in-bounds (slack reads are column-masked).
    When nT == 1 the neighbour-tile refs are not passed at all (no halo DMA).
    """
    if nT > 1:
        (a_ref, w1_ref, b1_ref, w2_ref, b2_ref, w3_ref, b3_ref,
         xprev_ref, xcur_ref, xnext_ref, fy_ref, cnn_ref, x_ext, h1_ext) = refs
    else:
        (a_ref, w1_ref, b1_ref, w2_ref, b2_ref, w3_ref, b3_ref,
         xcur_ref, fy_ref, cnn_ref, x_ext, h1_ext) = refs

    t = pl.program_id(1)
    f32 = jnp.float32
    n_ext = TH + 2 * HALO          # input rows needed for this tile (+-6)
    n1 = TH + 2 * (HALO - 2)       # conv1 output rows needed by conv2 (+-4)

    # ---- assemble the row-extended flat input tile in VMEM --------------------------------
    x_ext[:, 0:_SL] = jnp.zeros((C_IN, _SL), f32)
    x_ext[:, _SL + n_ext * W:] = jnp.zeros((C_IN, _SL), f32)
    x_ext[:, _SL + HALO * W:_SL + (HALO + TH) * W] = xcur_ref[0].astype(f32)
    if nT > 1:
        @pl.when(t > 0)
        def _():   # top halo = last HALO rows of the previous tile
            x_ext[:, _SL:_SL + HALO * W] = xprev_ref[0, :, (TH - HALO) * W:].astype(f32)

        @pl.when(t == 0)
        def _():   # image border: zero padding
            x_ext[:, _SL:_SL + HALO * W] = jnp.zeros((C_IN, HALO * W), f32)

        @pl.when(t < nT - 1)
        def _():   # bottom halo = first HALO rows of the next tile
            x_ext[:, _SL + (HALO + TH) * W:_SL + n_ext * W] = \
                xnext_ref[0, :, :HALO * W].astype(f32)

        @pl.when(t == nT - 1)
        def _():
            x_ext[:, _SL + (HALO + TH) * W:_SL + n_ext * W] = jnp.zeros((C_IN, HALO * W), f32)
    else:
        x_ext[:, _SL:_SL + HALO * W] = jnp.zeros((C_IN, HALO * W), f32)
        x_ext[:, _SL + (HALO + TH) * W:_SL + n_ext * W] = jnp.zeros((C_IN, HALO * W), f32)

    # ---- helper: 3x3 dilated 'same' conv on the flat channel-major buffer ------------------
    def conv3x3(src, w_ref, n_rows_out, dil, c_out):
        # src data row 0 sits `dil` rows above output row 0, so tap (kh, kw) is the contiguous
        # slice starting at  _SL + kh*dil*W + (kw-1)*dil .  Taps whose source column falls
        # outside the image are zero-masked per column-shift group (2 selects per conv).
        L = n_rows_out * W
        col = jax.lax.broadcasted_iota(jnp.int32, (1, L), 1) % W
        acc = jnp.zeros((c_out, L), jnp.float32)
        for kw in range(3):
            dc = (kw - 1) * dil
            part = jnp.zeros((c_out, L), jnp.float32)
            for kh in range(3):
                start = _SL + kh * dil * W + dc
                part = part + jnp.dot(w_ref[kh * 3 + kw], src[:, start:start + L],
                                      preferred_element_type=jnp.float32)
            if dc != 0:
                part = jnp.where((col + dc >= 0) & (col + dc < W), part, 0.0)
            acc = acc + part
        return acc

    def prelu(x, alpha):
        return jnp.where(x >= 0, x, alpha * x)

    # ---- conv1: 3x3 dil=2 + PReLU, computed on TH+8 rows (conv2 needs a +-4 row halo) -----
    h1 = conv3x3(x_ext, w1_ref, n1, 2, C_MID) + b1_ref[...]
    h1 = prelu(h1, a_ref[0])
    h1_ext[:, 0:_SL] = jnp.zeros((C_MID, _SL), f32)
    h1_ext[:, _SL + n1 * W:] = jnp.zeros((C_MID, _SL), f32)
    h1_ext[:, _SL:_SL + n1 * W] = h1

    # rows of h1 outside the image must be exactly zero for conv2's zero padding
    @pl.when(t == 0)
    def _():
        h1_ext[:, _SL:_SL + 4 * W] = jnp.zeros((C_MID, 4 * W), f32)

    @pl.when(t == nT - 1)
    def _():
        h1_ext[:, _SL + (TH + 4) * W:_SL + n1 * W] = jnp.zeros((C_MID, 4 * W), f32)

    # ---- conv2: 3x3 dil=4 + PReLU on the tile rows -----------------------------------------
    h2 = conv3x3(h1_ext, w2_ref, TH, 4, C_MID) + b2_ref[...]
    h2 = prelu(h2, a_ref[1])

    # ---- 1x1 conv + partial sigmoid (fy_preds = cat([sigmoid(p[:2]), p[2:]])) ---------------
    preds = jnp.dot(w3_ref[...], h2, preferred_element_type=jnp.float32) + b3_ref[...]
    ch = jax.lax.broadcasted_iota(jnp.int32, preds.shape, 0)
    preds = jnp.where(ch < 2, jax.nn.sigmoid(preds), preds)

    # ---- outputs: fy_preds and cnn_feats = cat([up1, fy_preds], dim=1), both NCHW ----------
    fy_ref[0] = preds.astype(fy_ref.dtype)
    cnn_ref[0, 0:C_IN, :] = xcur_ref[0].astype(cnn_ref.dtype)
    cnn_ref[0, C_IN:, :] = preds.astype(cnn_ref.dtype)


# ----------------------------------------------------------------------------- wrapper

def _pick_tile_h(H, W, max_flat=8192):
    """Row-tile size.  Prefer a single full-height tile (no halo DMA) when it fits the flat
    budget; otherwise the largest TH that divides H, is >= HALO (so the halo fits in one
    neighbouring tile), gives lane-aligned flat blocks (TH*W % 128 == 0) and stays under the
    budget.  Falls back to a single full-height tile."""
    if H * W <= max_flat:
        return H, 1
    best = None
    for th in range(HALO, H):
        if H % th == 0 and (th * W) % 128 == 0 and th * W <= max_flat:
            best = th
    if best is None:
        return H, 1
    return best, H // best


def textnet_forward(up1_nchw, params):
    """TextNet.forward after the FPN (is_training path): seg_head -> fy_preds, cnn_feats."""
    B, C, H, W = up1_nchw.shape
    assert C == C_IN, f"expected {C_IN}-channel FPN features, got {C}"
    TH, nT = _pick_tile_h(H, W)
    HW, THW = H * W, TH * W
    n_ext = TH + 2 * HALO
    n1 = TH + 2 * (HALO - 2)

    up1_flat = up1_nchw.reshape(B, C_IN, HW)                                    # free reshape
    w1 = jnp.transpose(params["w1"], (2, 3, 0, 1)).reshape(9, C_MID, C_IN)      # per-tap (O, I)
    w2 = jnp.transpose(params["w2"], (2, 3, 0, 1)).reshape(9, C_MID, C_MID)
    w3 = params["w3"].reshape(C_OUT, C_MID)
    b1 = params["b1"].reshape(C_MID, 1)
    b2 = params["b2"].reshape(C_MID, 1)
    b3 = params["b3"].reshape(C_OUT, 1)
    alphas = jnp.concatenate([params["a1"], params["a2"]]).astype(jnp.float32)  # (2,) -> SMEM

    kernel = functools.partial(_seg_head_kernel, W=W, TH=TH, nT=nT)
    const = lambda shape: pl.BlockSpec(shape, lambda b, t: (0,) * len(shape))

    in_specs = [
        pl.BlockSpec(memory_space=pltpu.MemorySpace.SMEM),                      # PReLU alphas
        const((9, C_MID, C_IN)), const((C_MID, 1)),                             # w1, b1
        const((9, C_MID, C_MID)), const((C_MID, 1)),                            # w2, b2
        const((C_OUT, C_MID)), const((C_OUT, 1)),                               # w3, b3
    ]
    inputs = [alphas, w1, b1, w2, b2, w3, b3]
    if nT > 1:
        in_specs += [
            pl.BlockSpec((1, C_IN, THW), lambda b, t: (b, 0, jnp.maximum(t - 1, 0))),
            pl.BlockSpec((1, C_IN, THW), lambda b, t: (b, 0, t)),
            pl.BlockSpec((1, C_IN, THW), lambda b, t: (b, 0, jnp.minimum(t + 1, nT - 1))),
        ]
        inputs += [up1_flat, up1_flat, up1_flat]
    else:
        in_specs += [pl.BlockSpec((1, C_IN, THW), lambda b, t: (b, 0, t))]
        inputs += [up1_flat]

    fy_flat, cnn_flat = pl.pallas_call(
        kernel,
        out_shape=(jax.ShapeDtypeStruct((B, C_OUT, HW), up1_nchw.dtype),
                   jax.ShapeDtypeStruct((B, C_IN + C_OUT, HW), up1_nchw.dtype)),
        grid=(B, nT),
        in_specs=in_specs,
        out_specs=(
            pl.BlockSpec((1, C_OUT, THW), lambda b, t: (b, 0, t)),
            pl.BlockSpec((1, C_IN + C_OUT, THW), lambda b, t: (b, 0, t)),
        ),
        scratch_shapes=[
            pltpu.VMEM((C_IN, 2 * _SL + n_ext * W), jnp.float32),   # row-extended input tile
            pltpu.VMEM((C_MID, 2 * _SL + n1 * W), jnp.float32),     # conv1 output (+-4 rows)
        ],
        compiler_params=pltpu.CompilerParams(
            dimension_semantics=("parallel", "parallel"),
            vmem_limit_bytes=32 * 1024 * 1024),
    )(*inputs)

    return {
        "fy_preds": fy_flat.reshape(B, C_OUT, H, W),
        "cnn_feats": cnn_flat.reshape(B, C_IN + C_OUT, H, W),
    }


# ----------------------------------------------------------------------------- params / reference

def init_params(key):
    """Deterministic synthetic seg_head parameters (shapes from the PyTorch __init__, OIHW)."""
    ks = jax.random.split(key, 6)
    std = 0.02
    return {
        "w1": jax.random.normal(ks[0], (C_MID, C_IN, 3, 3), jnp.float32) * std,
        "b1": jax.random.normal(ks[1], (C_MID,), jnp.float32) * 0.1,
        "a1": jnp.full((1,), 0.25, jnp.float32),              # nn.PReLU() default
        "w2": jax.random.normal(ks[2], (C_MID, C_MID, 3, 3), jnp.float32) * std,
        "b2": jax.random.normal(ks[3], (C_MID,), jnp.float32) * 0.1,
        "a2": jnp.full((1,), 0.25, jnp.float32),
        "w3": jax.random.normal(ks[4], (C_OUT, C_MID, 1, 1), jnp.float32) * std,
        "b3": jax.random.normal(ks[5], (C_OUT,), jnp.float32) * 0.1,
    }


def _ref_forward(up1, p):
    """Pure-JAX reference (NCHW) of seg_head + fy_preds + cnn_feats."""
    dn = ("NCHW", "OIHW", "NCHW")

    def dconv(x, w, b, d):
        y = jax.lax.conv_general_dilated(x, w, window_strides=(1, 1),
                                         padding=((d, d), (d, d)),
                                         rhs_dilation=(d, d), dimension_numbers=dn)
        return y + b.reshape(1, -1, 1, 1)

    prelu = lambda x, a: jnp.where(x >= 0, x, a * x)
    h = prelu(dconv(up1, p["w1"], p["b1"], 2), p["a1"][0])
    h = prelu(dconv(h, p["w2"], p["b2"], 4), p["a2"][0])
    preds = jax.lax.conv_general_dilated(h, p["w3"], (1, 1), "VALID",
                                         dimension_numbers=dn) + p["b3"].reshape(1, -1, 1, 1)
    fy = jnp.concatenate([jax.nn.sigmoid(preds[:, :2]), preds[:, 2:]], axis=1)
    return fy, jnp.concatenate([up1, fy], axis=1)


# ----------------------------------------------------------------------------- main

if __name__ == "__main__":
    key = jax.random.PRNGKey(0)
    k_feat, k_param = jax.random.split(key)

    B, H, W = 2, 16, 16                      # up1: FPN output (32 channels)
    up1_nchw = jax.random.normal(k_feat, (B, C_IN, H, W), jnp.float32)
    params = init_params(k_param)

    fwd = jax.jit(lambda u: textnet_forward(u, params))
    out = fwd(up1_nchw)
    jax.block_until_ready(out)

    assert out["fy_preds"].shape == (B, 4, H, W)
    assert out["cnn_feats"].shape == (B, 36, H, W)

    fy_ref, cnn_ref = _ref_forward(up1_nchw, params)
    np.testing.assert_allclose(np.asarray(out["fy_preds"]), np.asarray(fy_ref),
                               rtol=1e-4, atol=2e-4)
    np.testing.assert_allclose(np.asarray(out["cnn_feats"]), np.asarray(cnn_ref),
                               rtol=1e-4, atol=2e-4)

    # exercise the multi-tile (halo) path as well, to keep it correct on larger feature maps
    H2, W2 = 64, 128
    up1_big = jax.random.normal(jax.random.PRNGKey(1), (1, C_IN, H2, W2), jnp.float32)
    out_big = jax.jit(lambda u: textnet_forward(u, params))(up1_big)
    jax.block_until_ready(out_big)
    fy_ref_b, cnn_ref_b = _ref_forward(up1_big, params)
    np.testing.assert_allclose(np.asarray(out_big["fy_preds"]), np.asarray(fy_ref_b),
                               rtol=1e-4, atol=2e-4)
    np.testing.assert_allclose(np.asarray(out_big["cnn_feats"]), np.asarray(cnn_ref_b),
                               rtol=1e-4, atol=2e-4)

    print("KERNEL_OK")
</pallas_src>

<mosaic_0001>
module attributes {stable_mosaic.version = 11 : i64} {
  func.func @_seg_head_kernel(%arg0: i32, %arg1: i32, %arg2: memref<2xf32, #tpu.memory_space<smem>>, %arg3: memref<9x16x32xf32, #tpu.memory_space<vmem>>, %arg4: memref<16x1xf32, #tpu.memory_space<vmem>>, %arg5: memref<9x16x16xf32, #tpu.memory_space<vmem>>, %arg6: memref<16x1xf32, #tpu.memory_space<vmem>>, %arg7: memref<4x16xf32, #tpu.memory_space<vmem>>, %arg8: memref<4x1xf32, #tpu.memory_space<vmem>>, %arg9: memref<1x32x256xf32, #tpu.memory_space<vmem>>, %arg10: memref<1x4x256xf32, #tpu.memory_space<vmem>>, %arg11: memref<1x36x256xf32, #tpu.memory_space<vmem>>, %arg12: memref<32x456xf32, #tpu.memory_space<vmem>>, %arg13: memref<16x392xf32, #tpu.memory_space<vmem>>) attributes {dimension_semantics = [#tpu.dimension_semantics<parallel>, #tpu.dimension_semantics<parallel>], iteration_bounds = array<i64: 2, 1>, scalar_prefetch = 0 : i64, scratch_operands = 2 : i64, tpu.core_type = #tpu.core_type<tc>, window_params = [{transform_indices = @transform_0, window_bounds = array<i64: 2>}, {pipeline_mode = #tpu.pipeline_mode<synchronous>, transform_indices = @transform_1, window_bounds = array<i64: 9, 16, 32>}, {pipeline_mode = #tpu.pipeline_mode<synchronous>, transform_indices = @transform_2, window_bounds = array<i64: 16, 1>}, {pipeline_mode = #tpu.pipeline_mode<synchronous>, transform_indices = @transform_3, window_bounds = array<i64: 9, 16, 16>}, {pipeline_mode = #tpu.pipeline_mode<synchronous>, transform_indices = @transform_4, window_bounds = array<i64: 16, 1>}, {pipeline_mode = #tpu.pipeline_mode<synchronous>, transform_indices = @transform_5, window_bounds = array<i64: 4, 16>}, {pipeline_mode = #tpu.pipeline_mode<synchronous>, transform_indices = @transform_6, window_bounds = array<i64: 4, 1>}, {transform_indices = @transform_7, window_bounds = array<i64: 1, 32, 256>}, {transform_indices = @transform_8, window_bounds = array<i64: 1, 4, 256>}, {transform_indices = @transform_9, window_bounds = array<i64: 1, 36, 256>}]} {
    %cst = arith.constant 0.000000e+00 : f32
    %0 = vector.broadcast %cst : f32 to vector<32x4xf32>
    %c0 = arith.constant 0 : index
    %c0_0 = arith.constant 0 : index
    %1 = vector.load %arg12[%c0, %c0_0] : memref<32x456xf32, #tpu.memory_space<vmem>>, vector<32x4xf32>
    tpu.vector_store %arg12[%c0, %c0_0], %0 {strides = array<i32>} : memref<32x456xf32, #tpu.memory_space<vmem>>, vector<32x4xf32>,
    %cst_1 = arith.constant 0.000000e+00 : f32
    %2 = vector.broadcast %cst_1 : f32 to vector<32x4xf32>
    %c0_2 = arith.constant 0 : index
    %c452 = arith.constant 452 : index
    %3 = vector.load %arg12[%c0_2, %c452] : memref<32x456xf32, #tpu.memory_space<vmem>>, vector<32x4xf32>
    tpu.vector_store %arg12[%c0_2, %c452], %2 {strides = array<i32>} : memref<32x456xf32, #tpu.memory_space<vmem>>, vector<32x4xf32>,
    %c0_3 = arith.constant 0 : index
    %c0_4 = arith.constant 0 : index
    %c0_5 = arith.constant 0 : index
    %4 = vector.load %arg9[%c0_3, %c0_4, %c0_5] : memref<1x32x256xf32, #tpu.memory_space<vmem>>, vector<1x32x256xf32>
    %5 = vector.shape_cast %4 : vector<1x32x256xf32> to vector<32x256xf32>
    %c0_6 = arith.constant 0 : index
    %c100 = arith.constant 100 : index
    %6 = vector.load %arg12[%c0_6, %c100] : memref<32x456xf32, #tpu.memory_space<vmem>>, vector<32x256xf32>
    tpu.vector_store %arg12[%c0_6, %c100], %5 {strides = array<i32>} : memref<32x456xf32, #tpu.memory_space<vmem>>, vector<32x256xf32>,
    %cst_7 = arith.constant 0.000000e+00 : f32
    %7 = vector.broadcast %cst_7 : f32 to vector<32x96xf32>
    %c0_8 = arith.constant 0 : index
    %c4 = arith.constant 4 : index
    %8 = vector.load %arg12[%c0_8, %c4] : memref<32x456xf32, #tpu.memory_space<vmem>>, vector<32x96xf32>
    tpu.vector_store %arg12[%c0_8, %c4], %7 {strides = array<i32>} : memref<32x456xf32, #tpu.memory_space<vmem>>, vector<32x96xf32>,
    %cst_9 = arith.constant 0.000000e+00 : f32
    %9 = vector.broadcast %cst_9 : f32 to vector<32x96xf32>
    %c0_10 = arith.constant 0 : index
    %c356 = arith.constant 356 : index
    %10 = vector.load %arg12[%c0_10, %c356] : memref<32x456xf32, #tpu.memory_space<vmem>>, vector<32x96xf32>
    tpu.vector_store %arg12[%c0_10, %c356], %9 {strides = array<i32>} : memref<32x456xf32, #tpu.memory_space<vmem>>, vector<32x96xf32>,
    %11 = tpu.iota {dimensions = array<i32: 1>} : vector<1x384xi32>
    %c16_i32 = arith.constant 16 : i32
    %c0_i32 = arith.constant 0 : i32
    %12 = arith.cmpi eq, %c16_i32, %c0_i32 : i32
    %c1_i32 = arith.constant 1 : i32
    %13 = arith.select %12, %c1_i32, %c16_i32 : i32
    %14 = vector.broadcast %13 : i32 to vector<1x384xi32>
    %15 = arith.remsi %11, %14 : vector<1x384xi32>
    %c0_i32_11 = arith.constant 0 : i32
    %16 = vector.broadcast %c0_i32_11 : i32 to vector<1x384xi32>
    %17 = arith.cmpi ne, %15, %16 : vector<1x384xi32>
    %c0_i32_12 = arith.constant 0 : i32
    %18 = vector.broadcast %c0_i32_12 : i32 to vector<1x384xi32>
    %19 = arith.cmpi slt, %15, %18 : vector<1x384xi32>
    %c0_i32_13 = arith.constant 0 : i32
    %20 = arith.cmpi slt, %13, %c0_i32_13 : i32
    %21 = vector.broadcast %20 : i1 to vector<1x384xi1>
    %22 = vector.broadcast %21 : vector<1x384xi1> to vector<1x384xi1>
    %23 = arith.xori %19, %22 : vector<1x384xi1>
    %24 = arith.andi %23, %17 : vector<1x384xi1>
    %25 = vector.broadcast %13 : i32 to vector<1x384xi32>
    %26 = arith.addi %15, %25 : vector<1x384xi32>
    %27 = arith.select %24, %26, %15 : vector<1x384xi1>, vector<1x384xi32>
    %cst_14 = arith.constant 0.000000e+00 : f32
    %28 = vector.broadcast %cst_14 : f32 to vector<16x384xf32>
    %cst_15 = arith.constant 0.000000e+00 : f32
    %29 = vector.broadcast %cst_15 : f32 to vector<16x384xf32>
    %c0_16 = arith.constant 0 : index
    %c0_17 = arith.constant 0 : index
    %c0_18 = arith.constant 0 : index
    %30 = vector.load %arg3[%c0_16, %c0_17, %c0_18] : memref<9x16x32xf32, #tpu.memory_space<vmem>>, vector<1x16x32xf32>
    %31 = vector.shape_cast %30 : vector<1x16x32xf32> to vector<16x32xf32>
    %c0_19 = arith.constant 0 : index
    %c2 = arith.constant 2 : index
    %32 = vector.load %arg12[%c0_19, %c2] : memref<32x456xf32, #tpu.memory_space<vmem>>, vector<32x384xf32>
    %cst_20 = arith.constant dense<0.000000e+00> : vector<16x384xf32>
    %33 = tpu.matmul %31, %32, %cst_20 {dimension_numbers = #tpu.dot_dimension_numbers<[1], [0], [0], [1], [0, 0, 1, 1], [], []>} : vector<16x32xf32>, vector<32x384xf32>, vector<16x384xf32> -> vector<16x384xf32>
    %34 = arith.addf %29, %33 : vector<16x384xf32>
    %c3 = arith.constant 3 : index
    %c0_21 = arith.constant 0 : index
    %c0_22 = arith.constant 0 : index
    %35 = vector.load %arg3[%c3, %c0_21, %c0_22] : memref<9x16x32xf32, #tpu.memory_space<vmem>>, vector<1x16x32xf32>
    %36 = vector.shape_cast %35 : vector<1x16x32xf32> to vector<16x32xf32>
    %c0_23 = arith.constant 0 : index
    %c34 = arith.constant 34 : index
    %37 = vector.load %arg12[%c0_23, %c34] : memref<32x456xf32, #tpu.memory_space<vmem>>, vector<32x384xf32>
    %cst_24 = arith.constant dense<0.000000e+00> : vector<16x384xf32>
    %38 = tpu.matmul %36, %37, %cst_24 {dimension_numbers = #tpu.dot_dimension_numbers<[1], [0], [0], [1], [0, 0, 1, 1], [], []>} : vector<16x32xf32>, vector<32x384xf32>, vector<16x384xf32> -> vector<16x384xf32>
    %39 = arith.addf %34, %38 : vector<16x384xf32>
    %c6 = arith.constant 6 : index
    %c0_25 = arith.constant 0 : index
    %c0_26 = arith.constant 0 : index
    %40 = vector.load %arg3[%c6, %c0_25, %c0_26] : memref<9x16x32xf32, #tpu.memory_space<vmem>>, vector<1x16x32xf32>
    %41 = vector.shape_cast %40 : vector<1x16x32xf32> to vector<16x32xf32>
    %c0_27 = arith.constant 0 : index
    %c66 = arith.constant 66 : index
    %42 = vector.load %arg12[%c0_27, %c66] : memref<32x456xf32, #tpu.memory_space<vmem>>, vector<32x384xf32>
    %cst_28 = arith.constant dense<0.000000e+00> : vector<16x384xf32>
    %43 = tpu.matmul %41, %42, %cst_28 {dimension_numbers = #tpu.dot_dimension_numbers<[1], [0], [0], [1], [0, 0, 1, 1], [], []>} : vector<16x32xf32>, vector<32x384xf32>, vector<16x384xf32> -> vector<16x384xf32>
    %44 = arith.addf %39, %43 : vector<16x384xf32>
    %c-2_i32 = arith.constant -2 : i32
    %45 = vector.broadcast %c-2_i32 : i32 to vector<1x384xi32>
    %46 = arith.addi %27, %45 : vector<1x384xi32>
    %c0_i32_29 = arith.constant 0 : i32
    %47 = vector.broadcast %c0_i32_29 : i32 to vector<1x384xi32>
    %48 = arith.cmpi sge, %46, %47 : vector<1x384xi32>
    %c-2_i32_30 = arith.constant -2 : i32
    %49 = vector.broadcast %c-2_i32_30 : i32 to vector<1x384xi32>
    %50 = arith.addi %27, %49 : vector<1x384xi32>
    %c16_i32_31 = arith.constant 16 : i32
    %51 = vector.broadcast %c16_i32_31 : i32 to vector<1x384xi32>
    %52 = arith.cmpi slt, %50, %51 : vector<1x384xi32>
    %53 = arith.andi %48, %52 : vector<1x384xi1>
    %cst_32 = arith.constant 0.000000e+00 : f32
    %54 = vector.shape_cast %53 : vector<1x384xi1> to vector<1x384xi1>
    %55 = vector.broadcast %54 : vector<1x384xi1> to vector<16x384xi1>
    %56 = vector.broadcast %cst_32 : f32 to vector<16x384xf32>
    %57 = arith.select %55, %44, %56 : vector<16x384xi1>, vector<16x384xf32>
    %58 = arith.addf %28, %57 : vector<16x384xf32>
    %cst_33 = arith.constant 0.000000e+00 : f32
    %59 = vector.broadcast %cst_33 : f32 to vector<16x384xf32>
    %c1 = arith.constant 1 : index
    %c0_34 = arith.constant 0 : index
    %c0_35 = arith.constant 0 : index
    %60 = vector.load %arg3[%c1, %c0_34, %c0_35] : memref<9x16x32xf32, #tpu.memory_space<vmem>>, vector<1x16x32xf32>
    %61 = vector.shape_cast %60 : vector<1x16x32xf32> to vector<16x32xf32>
    %c0_36 = arith.constant 0 : index
    %c4_37 = arith.constant 4 : index
    %62 = vector.load %arg12[%c0_36, %c4_37] : memref<32x456xf32, #tpu.memory_space<vmem>>, vector<32x384xf32>
    %cst_38 = arith.constant dense<0.000000e+00> : vector<16x384xf32>
    %63 = tpu.matmul %61, %62, %cst_38 {dimension_numbers = #tpu.dot_dimension_numbers<[1], [0], [0], [1], [0, 0, 1, 1], [], []>} : vector<16x32xf32>, vector<32x384xf32>, vector<16x384xf32> -> vector<16x384xf32>
    %64 = arith.addf %59, %63 : vector<16x384xf32>
    %c4_39 = arith.constant 4 : index
    %c0_40 = arith.constant 0 : index
    %c0_41 = arith.constant 0 : index
    %65 = vector.load %arg3[%c4_39, %c0_40, %c0_41] : memref<9x16x32xf32, #tpu.memory_space<vmem>>, vector<1x16x32xf32>
    %66 = vector.shape_cast %65 : vector<1x16x32xf32> to vector<16x32xf32>
    %c0_42 = arith.constant 0 : index
    %c36 = arith.constant 36 : index
    %67 = vector.load %arg12[%c0_42, %c36] : memref<32x456xf32, #tpu.memory_space<vmem>>, vector<32x384xf32>
    %cst_43 = arith.constant dense<0.000000e+00> : vector<16x384xf32>
    %68 = tpu.matmul %66, %67, %cst_43 {dimension_numbers = #tpu.dot_dimension_numbers<[1], [0], [0], [1], [0, 0, 1, 1], [], []>} : vector<16x32xf32>, vector<32x384xf32>, vector<16x384xf32> -> vector<16x384xf32>
    %69 = arith.addf %64, %68 : vector<16x384xf32>
    %c7 = arith.constant 7 : index
    %c0_44 = arith.constant 0 : index
    %c0_45 = arith.constant 0 : index
    %70 = vector.load %arg3[%c7, %c0_44, %c0_45] : memref<9x16x32xf32, #tpu.memory_space<vmem>>, vector<1x16x32xf32>
    %71 = vector.shape_cast %70 : vector<1x16x32xf32> to vector<16x32xf32>
    %c0_46 = arith.constant 0 : index
    %c68 = arith.constant 68 : index
    %72 = vector.load %arg12[%c0_46, %c68] : memref<32x456xf32, #tpu.memory_space<vmem>>, vector<32x384xf32>
    %cst_47 = arith.constant dense<0.000000e+00> : vector<16x384xf32>
    %73 = tpu.matmul %71, %72, %cst_47 {dimension_numbers = #tpu.dot_dimension_numbers<[1], [0], [0], [1], [0, 0, 1, 1], [], []>} : vector<16x32xf32>, vector<32x384xf32>, vector<16x384xf32> -> vector<16x384xf32>
    %74 = arith.addf %69, %73 : vector<16x384xf32>
    %75 = arith.addf %58, %74 : vector<16x384xf32>
    %cst_48 = arith.constant 0.000000e+00 : f32
    %76 = vector.broadcast %cst_48 : f32 to vector<16x384xf32>
    %c2_49 = arith.constant 2 : index
    %c0_50 = arith.constant 0 : index
    %c0_51 = arith.constant 0 : index
    %77 = vector.load %arg3[%c2_49, %c0_50, %c0_51] : memref<9x16x32xf32, #tpu.memory_space<vmem>>, vector<1x16x32xf32>
    %78 = vector.shape_cast %77 : vector<1x16x32xf32> to vector<16x32xf32>
    %c0_52 = arith.constant 0 : index
    %c6_53 = arith.constant 6 : index
    %79 = vector.load %arg12[%c0_52, %c6_53] : memref<32x456xf32, #tpu.memory_space<vmem>>, vector<32x384xf32>
    %cst_54 = arith.constant dense<0.000000e+00> : vector<16x384xf32>
    %80 = tpu.matmul %78, %79, %cst_54 {dimension_numbers = #tpu.dot_dimension_numbers<[1], [0], [0], [1], [0, 0, 1, 1], [], []>} : vector<16x32xf32>, vector<32x384xf32>, vector<16x384xf32> -> vector<16x384xf32>
    %81 = arith.addf %76, %80 : vector<16x384xf32>
    %c5 = arith.constant 5 : index
    %c0_55 = arith.constant 0 : index
    %c0_56 = arith.constant 0 : index
    %82 = vector.load %arg3[%c5, %c0_55, %c0_56] : memref<9x16x32xf32, #tpu.memory_space<vmem>>, vector<1x16x32xf32>
    %83 = vector.shape_cast %82 : vector<1x16x32xf32> to vector<16x32xf32>
    %c0_57 = arith.constant 0 : index
    %c38 = arith.constant 38 : index
    %84 = vector.load %arg12[%c0_57, %c38] : memref<32x456xf32, #tpu.memory_space<vmem>>, vector<32x384xf32>
    %cst_58 = arith.constant dense<0.000000e+00> : vector<16x384xf32>
    %85 = tpu.matmul %83, %84, %cst_58 {dimension_numbers = #tpu.dot_dimension_numbers<[1], [0], [0], [1], [0, 0, 1, 1], [], []>} : vector<16x32xf32>, vector<32x384xf32>, vector<16x384xf32> -> vector<16x384xf32>
    %86 = arith.addf %81, %85 : vector<16x384xf32>
    %c8 = arith.constant 8 : index
    %c0_59 = arith.constant 0 : index
    %c0_60 = arith.constant 0 : index
    %87 = vector.load %arg3[%c8, %c0_59, %c0_60] : memref<9x16x32xf32, #tpu.memory_space<vmem>>, vector<1x16x32xf32>
    %88 = vector.shape_cast %87 : vector<1x16x32xf32> to vector<16x32xf32>
    %c0_61 = arith.constant 0 : index
    %c70 = arith.constant 70 : index
    %89 = vector.load %arg12[%c0_61, %c70] : memref<32x456xf32, #tpu.memory_space<vmem>>, vector<32x384xf32>
    %cst_62 = arith.constant dense<0.000000e+00> : vector<16x384xf32>
    %90 = tpu.matmul %88, %89, %cst_62 {dimension_numbers = #tpu.dot_dimension_numbers<[1], [0], [0], [1], [0, 0, 1, 1], [], []>} : vector<16x32xf32>, vector<32x384xf32>, vector<16x384xf32> -> vector<16x384xf32>
    %91 = arith.addf %86, %90 : vector<16x384xf32>
    %c2_i32 = arith.constant 2 : i32
    %92 = vector.broadcast %c2_i32 : i32 to vector<1x384xi32>
    %93 = arith.addi %27, %92 : vector<1x384xi32>
    %c0_i32_63 = arith.constant 0 : i32
    %94 = vector.broadcast %c0_i32_63 : i32 to vector<1x384xi32>
    %95 = arith.cmpi sge, %93, %94 : vector<1x384xi32>
    %c2_i32_64 = arith.constant 2 : i32
    %96 = vector.broadcast %c2_i32_64 : i32 to vector<1x384xi32>
    %97 = arith.addi %27, %96 : vector<1x384xi32>
    %c16_i32_65 = arith.constant 16 : i32
    %98 = vector.broadcast %c16_i32_65 : i32 to vector<1x384xi32>
    %99 = arith.cmpi slt, %97, %98 : vector<1x384xi32>
    %100 = arith.andi %95, %99 : vector<1x384xi1>
    %cst_66 = arith.constant 0.000000e+00 : f32
    %101 = vector.shape_cast %100 : vector<1x384xi1> to vector<1x384xi1>
    %102 = vector.broadcast %101 : vector<1x384xi1> to vector<16x384xi1>
    %103 = vector.broadcast %cst_66 : f32 to vector<16x384xf32>
    %104 = arith.select %102, %91, %103 : vector<16x384xi1>, vector<16x384xf32>
    %105 = arith.addf %75, %104 : vector<16x384xf32>
    %c0_67 = arith.constant 0 : index
    %c0_68 = arith.constant 0 : index
    %106 = vector.load %arg4[%c0_67, %c0_68] : memref<16x1xf32, #tpu.memory_space<vmem>>, vector<16x1xf32>
    %107 = vector.broadcast %106 : vector<16x1xf32> to vector<16x384xf32>
    %108 = arith.addf %105, %107 : vector<16x384xf32>
    %c0_69 = arith.constant 0 : index
    %109 = memref.load %arg2[%c0_69] : memref<2xf32, #tpu.memory_space<smem>>
    %cst_70 = arith.constant 0.000000e+00 : f32
    %110 = vector.broadcast %cst_70 : f32 to vector<16x384xf32>
    %111 = arith.cmpf oge, %108, %110 : vector<16x384xf32>
    %112 = vector.broadcast %109 : f32 to vector<16x384xf32>
    %113 = arith.mulf %112, %108 : vector<16x384xf32>
    %114 = arith.select %111, %108, %113 : vector<16x384xi1>, vector<16x384xf32>
    %cst_71 = arith.constant 0.000000e+00 : f32
    %115 = vector.broadcast %cst_71 : f32 to vector<16x4xf32>
    %c0_72 = arith.constant 0 : index
    %c0_73 = arith.constant 0 : index
    %116 = vector.load %arg13[%c0_72, %c0_73] : memref<16x392xf32, #tpu.memory_space<vmem>>, vector<16x4xf32>
    tpu.vector_store %arg13[%c0_72, %c0_73], %115 {strides = array<i32>} : memref<16x392xf32, #tpu.memory_space<vmem>>, vector<16x4xf32>,
    %cst_74 = arith.constant 0.000000e+00 : f32
    %117 = vector.broadcast %cst_74 : f32 to vector<16x4xf32>
    %c0_75 = arith.constant 0 : index
    %c388 = arith.constant 388 : index
    %118 = vector.load %arg13[%c0_75, %c388] : memref<16x392xf32, #tpu.memory_space<vmem>>, vector<16x4xf32>
    tpu.vector_store %arg13[%c0_75, %c388], %117 {strides = array<i32>} : memref<16x392xf32, #tpu.memory_space<vmem>>, vector<16x4xf32>,
    %c0_76 = arith.constant 0 : index
    %c4_77 = arith.constant 4 : index
    %119 = vector.load %arg13[%c0_76, %c4_77] : memref<16x392xf32, #tpu.memory_space<vmem>>, vector<16x384xf32>
    tpu.vector_store %arg13[%c0_76, %c4_77], %114 {strides = array<i32>} : memref<16x392xf32, #tpu.memory_space<vmem>>, vector<16x384xf32>,
    %c0_i32_78 = arith.constant 0 : i32
    %120 = arith.cmpi eq, %arg1, %c0_i32_78 : i32
    %121 = arith.extui %120 : i1 to i32
    %c0_i32_79 = arith.constant 0 : i32
    %122 = arith.cmpi ne, %121, %c0_i32_79 : i32
    scf.if %122 {
      %cst_171 = arith.constant 0.000000e+00 : f32
      %255 = vector.broadcast %cst_171 : f32 to vector<16x64xf32>
      %c0_172 = arith.constant 0 : index
      %c4_173 = arith.constant 4 : index
      %256 = vector.load %arg13[%c0_172, %c4_173] : memref<16x392xf32, #tpu.memory_space<vmem>>, vector<16x64xf32>
      tpu.vector_store %arg13[%c0_172, %c4_173], %255 {strides = array<i32>} : memref<16x392xf32, #tpu.memory_space<vmem>>, vector<16x64xf32>,
    } else {
    }
    %c0_i32_80 = arith.constant 0 : i32
    %123 = arith.cmpi eq, %arg1, %c0_i32_80 : i32
    %124 = arith.extui %123 : i1 to i32
    %c0_i32_81 = arith.constant 0 : i32
    %125 = arith.cmpi ne, %124, %c0_i32_81 : i32
    scf.if %125 {
      %cst_171 = arith.constant 0.000000e+00 : f32
      %255 = vector.broadcast %cst_171 : f32 to vector<16x64xf32>
      %c0_172 = arith.constant 0 : index
      %c324 = arith.constant 324 : index
      %256 = vector.load %arg13[%c0_172, %c324] : memref<16x392xf32, #tpu.memory_space<vmem>>, vector<16x64xf32>
      tpu.vector_store %arg13[%c0_172, %c324], %255 {strides = array<i32>} : memref<16x392xf32, #tpu.memory_space<vmem>>, vector<16x64xf32>,
    } else {
    }
    %126 = tpu.iota {dimensions = array<i32: 1>} : vector<1x256xi32>
    %c16_i32_82 = arith.constant 16 : i32
    %c0_i32_83 = arith.constant 0 : i32
    %127 = arith.cmpi eq, %c16_i32_82, %c0_i32_83 : i32
    %c1_i32_84 = arith.constant 1 : i32
    %128 = arith.select %127, %c1_i32_84, %c16_i32_82 : i32
    %129 = vector.broadcast %128 : i32 to vector<1x256xi32>
    %130 = arith.remsi %126, %129 : vector<1x256xi32>
    %c0_i32_85 = arith.constant 0 : i32
    %131 = vector.broadcast %c0_i32_85 : i32 to vector<1x256xi32>
    %132 = arith.cmpi ne, %130, %131 : vector<1x256xi32>
    %c0_i32_86 = arith.constant 0 : i32
    %133 = vector.broadcast %c0_i32_86 : i32 to vector<1x256xi32>
    %134 = arith.cmpi slt, %130, %133 : vector<1x256xi32>
    %c0_i32_87 = arith.constant 0 : i32
    %135 = arith.cmpi slt, %128, %c0_i32_87 : i32
    %136 = vector.broadcast %135 : i1 to vector<1x256xi1>
    %137 = vector.broadcast %136 : vector<1x256xi1> to vector<1x256xi1>
    %138 = arith.xori %134, %137 : vector<1x256xi1>
    %139 = arith.andi %138, %132 : vector<1x256xi1>
    %140 = vector.broadcast %128 : i32 to vector<1x256xi32>
    %141 = arith.addi %130, %140 : vector<1x256xi32>
    %142 = arith.select %139, %141, %130 : vector<1x256xi1>, vector<1x256xi32>
    %cst_88 = arith.constant 0.000000e+00 : f32
    %143 = vector.broadcast %cst_88 : f32 to vector<16x256xf32>
    %cst_89 = arith.constant 0.000000e+00 : f32
    %144 = vector.broadcast %cst_89 : f32 to vector<16x256xf32>
    %c0_90 = arith.constant 0 : index
    %c0_91 = arith.constant 0 : index
    %c0_92 = arith.constant 0 : index
    %145 = vector.load %arg5[%c0_90, %c0_91, %c0_92] : memref<9x16x16xf32, #tpu.memory_space<vmem>>, vector<1x16x16xf32>
    %146 = vector.shape_cast %145 : vector<1x16x16xf32> to vector<16x16xf32>
    %c0_93 = arith.constant 0 : index
    %c0_94 = arith.constant 0 : index
    %147 = vector.load %arg13[%c0_93, %c0_94] : memref<16x392xf32, #tpu.memory_space<vmem>>, vector<16x256xf32>
    %cst_95 = arith.constant dense<0.000000e+00> : vector<16x256xf32>
    %148 = tpu.matmul %146, %147, %cst_95 {dimension_numbers = #tpu.dot_dimension_numbers<[1], [0], [0], [1], [0, 0, 1, 1], [], []>} : vector<16x16xf32>, vector<16x256xf32>, vector<16x256xf32> -> vector<16x256xf32>
    %149 = arith.addf %144, %148 : vector<16x256xf32>
    %c3_96 = arith.constant 3 : index
    %c0_97 = arith.constant 0 : index
    %c0_98 = arith.constant 0 : index
    %150 = vector.load %arg5[%c3_96, %c0_97, %c0_98] : memref<9x16x16xf32, #tpu.memory_space<vmem>>, vector<1x16x16xf32>
    %151 = vector.shape_cast %150 : vector<1x16x16xf32> to vector<16x16xf32>
    %c0_99 = arith.constant 0 : index
    %c64 = arith.constant 64 : index
    %152 = vector.load %arg13[%c0_99, %c64] : memref<16x392xf32, #tpu.memory_space<vmem>>, vector<16x256xf32>
    %cst_100 = arith.constant dense<0.000000e+00> : vector<16x256xf32>
    %153 = tpu.matmul %151, %152, %cst_100 {dimension_numbers = #tpu.dot_dimension_numbers<[1], [0], [0], [1], [0, 0, 1, 1], [], []>} : vector<16x16xf32>, vector<16x256xf32>, vector<16x256xf32> -> vector<16x256xf32>
    %154 = arith.addf %149, %153 : vector<16x256xf32>
    %c6_101 = arith.constant 6 : index
    %c0_102 = arith.constant 0 : index
    %c0_103 = arith.constant 0 : index
    %155 = vector.load %arg5[%c6_101, %c0_102, %c0_103] : memref<9x16x16xf32, #tpu.memory_space<vmem>>, vector<1x16x16xf32>
    %156 = vector.shape_cast %155 : vector<1x16x16xf32> to vector<16x16xf32>
    %c0_104 = arith.constant 0 : index
    %c128 = arith.constant 128 : index
    %157 = vector.load %arg13[%c0_104, %c128] : memref<16x392xf32, #tpu.memory_space<vmem>>, vector<16x256xf32>
    %cst_105 = arith.constant dense<0.000000e+00> : vector<16x256xf32>
    %158 = tpu.matmul %156, %157, %cst_105 {dimension_numbers = #tpu.dot_dimension_numbers<[1], [0], [0], [1], [0, 0, 1, 1], [], []>} : vector<16x16xf32>, vector<16x256xf32>, vector<16x256xf32> -> vector<16x256xf32>
    %159 = arith.addf %154, %158 : vector<16x256xf32>
    %c-4_i32 = arith.constant -4 : i32
    %160 = vector.broadcast %c-4_i32 : i32 to vector<1x256xi32>
    %161 = arith.addi %142, %160 : vector<1x256xi32>
    %c0_i32_106 = arith.constant 0 : i32
    %162 = vector.broadcast %c0_i32_106 : i32 to vector<1x256xi32>
    %163 = arith.cmpi sge, %161, %162 : vector<1x256xi32>
    %c-4_i32_107 = arith.constant -4 : i32
    %164 = vector.broadcast %c-4_i32_107 : i32 to vector<1x256xi32>
    %165 = arith.addi %142, %164 : vector<1x256xi32>
    %c16_i32_108 = arith.constant 16 : i32
    %166 = vector.broadcast %c16_i32_108 : i32 to vector<1x256xi32>
    %167 = arith.cmpi slt, %165, %166 : vector<1x256xi32>
    %168 = arith.andi %163, %167 : vector<1x256xi1>
    %cst_109 = arith.constant 0.000000e+00 : f32
    %169 = vector.shape_cast %168 : vector<1x256xi1> to vector<1x256xi1>
    %170 = vector.broadcast %169 : vector<1x256xi1> to vector<16x256xi1>
    %171 = vector.broadcast %cst_109 : f32 to vector<16x256xf32>
    %172 = arith.select %170, %159, %171 : vector<16x256xi1>, vector<16x256xf32>
    %173 = arith.addf %143, %172 : vector<16x256xf32>
    %cst_110 = arith.constant 0.000000e+00 : f32
    %174 = vector.broadcast %cst_110 : f32 to vector<16x256xf32>
    %c1_111 = arith.constant 1 : index
    %c0_112 = arith.constant 0 : index
    %c0_113 = arith.constant 0 : index
    %175 = vector.load %arg5[%c1_111, %c0_112, %c0_113] : memref<9x16x16xf32, #tpu.memory_space<vmem>>, vector<1x16x16xf32>
    %176 = vector.shape_cast %175 : vector<1x16x16xf32> to vector<16x16xf32>
    %c0_114 = arith.constant 0 : index
    %c4_115 = arith.constant 4 : index
    %177 = vector.load %arg13[%c0_114, %c4_115] : memref<16x392xf32, #tpu.memory_space<vmem>>, vector<16x256xf32>
    %cst_116 = arith.constant dense<0.000000e+00> : vector<16x256xf32>
    %178 = tpu.matmul %176, %177, %cst_116 {dimension_numbers = #tpu.dot_dimension_numbers<[1], [0], [0], [1], [0, 0, 1, 1], [], []>} : vector<16x16xf32>, vector<16x256xf32>, vector<16x256xf32> -> vector<16x256xf32>
    %179 = arith.addf %174, %178 : vector<16x256xf32>
    %c4_117 = arith.constant 4 : index
    %c0_118 = arith.constant 0 : index
    %c0_119 = arith.constant 0 : index
    %180 = vector.load %arg5[%c4_117, %c0_118, %c0_119] : memref<9x16x16xf32, #tpu.memory_space<vmem>>, vector<1x16x16xf32>
    %181 = vector.shape_cast %180 : vector<1x16x16xf32> to vector<16x16xf32>
    %c0_120 = arith.constant 0 : index
    %c68_121 = arith.constant 68 : index
    %182 = vector.load %arg13[%c0_120, %c68_121] : memref<16x392xf32, #tpu.memory_space<vmem>>, vector<16x256xf32>
    %cst_122 = arith.constant dense<0.000000e+00> : vector<16x256xf32>
    %183 = tpu.matmul %181, %182, %cst_122 {dimension_numbers = #tpu.dot_dimension_numbers<[1], [0], [0], [1], [0, 0, 1, 1], [], []>} : vector<16x16xf32>, vector<16x256xf32>, vector<16x256xf32> -> vector<16x256xf32>
    %184 = arith.addf %179, %183 : vector<16x256xf32>
    %c7_123 = arith.constant 7 : index
    %c0_124 = arith.constant 0 : index
    %c0_125 = arith.constant 0 : index
    %185 = vector.load %arg5[%c7_123, %c0_124, %c0_125] : memref<9x16x16xf32, #tpu.memory_space<vmem>>, vector<1x16x16xf32>
    %186 = vector.shape_cast %185 : vector<1x16x16xf32> to vector<16x16xf32>
    %c0_126 = arith.constant 0 : index
    %c132 = arith.constant 132 : index
    %187 = vector.load %arg13[%c0_126, %c132] : memref<16x392xf32, #tpu.memory_space<vmem>>, vector<16x256xf32>
    %cst_127 = arith.constant dense<0.000000e+00> : vector<16x256xf32>
    %188 = tpu.matmul %186, %187, %cst_127 {dimension_numbers = #tpu.dot_dimension_numbers<[1], [0], [0], [1], [0, 0, 1, 1], [], []>} : vector<16x16xf32>, vector<16x256xf32>, vector<16x256xf32> -> vector<16x256xf32>
    %189 = arith.addf %184, %188 : vector<16x256xf32>
    %190 = arith.addf %173, %189 : vector<16x256xf32>
    %cst_128 = arith.constant 0.000000e+00 : f32
    %191 = vector.broadcast %cst_128 : f32 to vector<16x256xf32>
    %c2_129 = arith.constant 2 : index
    %c0_130 = arith.constant 0 : index
    %c0_131 = arith.constant 0 : index
    %192 = vector.load %arg5[%c2_129, %c0_130, %c0_131] : memref<9x16x16xf32, #tpu.memory_space<vmem>>, vector<1x16x16xf32>
    %193 = vector.shape_cast %192 : vector<1x16x16xf32> to vector<16x16xf32>
    %c0_132 = arith.constant 0 : index
    %c8_133 = arith.constant 8 : index
    %194 = vector.load %arg13[%c0_132, %c8_133] : memref<16x392xf32, #tpu.memory_space<vmem>>, vector<16x256xf32>
    %cst_134 = arith.constant dense<0.000000e+00> : vector<16x256xf32>
    %195 = tpu.matmul %193, %194, %cst_134 {dimension_numbers = #tpu.dot_dimension_numbers<[1], [0], [0], [1], [0, 0, 1, 1], [], []>} : vector<16x16xf32>, vector<16x256xf32>, vector<16x256xf32> -> vector<16x256xf32>
    %196 = arith.addf %191, %195 : vector<16x256xf32>
    %c5_135 = arith.constant 5 : index
    %c0_136 = arith.constant 0 : index
    %c0_137 = arith.constant 0 : index
    %197 = vector.load %arg5[%c5_135, %c0_136, %c0_137] : memref<9x16x16xf32, #tpu.memory_space<vmem>>, vector<1x16x16xf32>
    %198 = vector.shape_cast %197 : vector<1x16x16xf32> to vector<16x16xf32>
    %c0_138 = arith.constant 0 : index
    %c72 = arith.constant 72 : index
    %199 = vector.load %arg13[%c0_138, %c72] : memref<16x392xf32, #tpu.memory_space<vmem>>, vector<16x256xf32>
    %cst_139 = arith.constant dense<0.000000e+00> : vector<16x256xf32>
    %200 = tpu.matmul %198, %199, %cst_139 {dimension_numbers = #tpu.dot_dimension_numbers<[1], [0], [0], [1], [0, 0, 1, 1], [], []>} : vector<16x16xf32>, vector<16x256xf32>, vector<16x256xf32> -> vector<16x256xf32>
    %201 = arith.addf %196, %200 : vector<16x256xf32>
    %c8_140 = arith.constant 8 : index
    %c0_141 = arith.constant 0 : index
    %c0_142 = arith.constant 0 : index
    %202 = vector.load %arg5[%c8_140, %c0_141, %c0_142] : memref<9x16x16xf32, #tpu.memory_space<vmem>>, vector<1x16x16xf32>
    %203 = vector.shape_cast %202 : vector<1x16x16xf32> to vector<16x16xf32>
    %c0_143 = arith.constant 0 : index
    %c136 = arith.constant 136 : index
    %204 = vector.load %arg13[%c0_143, %c136] : memref<16x392xf32, #tpu.memory_space<vmem>>, vector<16x256xf32>
    %cst_144 = arith.constant dense<0.000000e+00> : vector<16x256xf32>
    %205 = tpu.matmul %203, %204, %cst_144 {dimension_numbers = #tpu.dot_dimension_numbers<[1], [0], [0], [1], [0, 0, 1, 1], [], []>} : vector<16x16xf32>, vector<16x256xf32>, vector<16x256xf32> -> vector<16x256xf32>
    %206 = arith.addf %201, %205 : vector<16x256xf32>
    %c4_i32 = arith.constant 4 : i32
    %207 = vector.broadcast %c4_i32 : i32 to vector<1x256xi32>
    %208 = arith.addi %142, %207 : vector<1x256xi32>
    %c0_i32_145 = arith.constant 0 : i32
    %209 = vector.broadcast %c0_i32_145 : i32 to vector<1x256xi32>
    %210 = arith.cmpi sge, %208, %209 : vector<1x256xi32>
    %c4_i32_146 = arith.constant 4 : i32
    %211 = vector.broadcast %c4_i32_146 : i32 to vector<1x256xi32>
    %212 = arith.addi %142, %211 : vector<1x256xi32>
    %c16_i32_147 = arith.constant 16 : i32
    %213 = vector.broadcast %c16_i32_147 : i32 to vector<1x256xi32>
    %214 = arith.cmpi slt, %212, %213 : vector<1x256xi32>
    %215 = arith.andi %210, %214 : vector<1x256xi1>
    %cst_148 = arith.constant 0.000000e+00 : f32
    %216 = vector.shape_cast %215 : vector<1x256xi1> to vector<1x256xi1>
    %217 = vector.broadcast %216 : vector<1x256xi1> to vector<16x256xi1>
    %218 = vector.broadcast %cst_148 : f32 to vector<16x256xf32>
    %219 = arith.select %217, %206, %218 : vector<16x256xi1>, vector<16x256xf32>
    %220 = arith.addf %190, %219 : vector<16x256xf32>
    %c0_149 = arith.constant 0 : index
    %c0_150 = arith.constant 0 : index
    %221 = vector.load %arg6[%c0_149, %c0_150] : memref<16x1xf32, #tpu.memory_space<vmem>>, vector<16x1xf32>
    %222 = vector.broadcast %221 : vector<16x1xf32> to vector<16x256xf32>
    %223 = arith.addf %220, %222 : vector<16x256xf32>
    %c1_151 = arith.constant 1 : index
    %224 = memref.load %arg2[%c1_151] : memref<2xf32, #tpu.memory_space<smem>>
    %cst_152 = arith.constant 0.000000e+00 : f32
    %225 = vector.broadcast %cst_152 : f32 to vector<16x256xf32>
    %226 = arith.cmpf oge, %223, %225 : vector<16x256xf32>
    %227 = vector.broadcast %224 : f32 to vector<16x256xf32>
    %228 = arith.mulf %227, %223 : vector<16x256xf32>
    %229 = arith.select %226, %223, %228 : vector<16x256xi1>, vector<16x256xf32>
    %c0_153 = arith.constant 0 : index
    %c0_154 = arith.constant 0 : index
    %230 = vector.load %arg7[%c0_153, %c0_154] : memref<4x16xf32, #tpu.memory_space<vmem>>, vector<4x16xf32>
    %cst_155 = arith.constant dense<0.000000e+00> : vector<4x256xf32>
    %231 = tpu.matmul %230, %229, %cst_155 {dimension_numbers = #tpu.dot_dimension_numbers<[1], [0], [0], [1], [0, 0, 1, 1], [], []>} : vector<4x16xf32>, vector<16x256xf32>, vector<4x256xf32> -> vector<4x256xf32>
    %c0_156 = arith.constant 0 : index
    %c0_157 = arith.constant 0 : index
    %232 = vector.load %arg8[%c0_156, %c0_157] : memref<4x1xf32, #tpu.memory_space<vmem>>, vector<4x1xf32>
    %233 = vector.broadcast %232 : vector<4x1xf32> to vector<4x256xf32>
    %234 = arith.addf %231, %233 : vector<4x256xf32>
    %235 = tpu.iota {dimensions = array<i32: 0>} : vector<4x256xi32>
    %c2_i32_158 = arith.constant 2 : i32
    %236 = vector.broadcast %c2_i32_158 : i32 to vector<4x256xi32>
    %237 = arith.cmpi slt, %235, %236 : vector<4x256xi32>
    %238 = arith.negf %234 : vector<4x256xf32>
    %239 = math.exp %238 : vector<4x256xf32>
    %cst_159 = arith.constant 1.000000e+00 : f32
    %240 = vector.broadcast %cst_159 : f32 to vector<4x256xf32>
    %241 = arith.addf %240, %239 : vector<4x256xf32>
    %242 = arith.divf %240, %241 : vector<4x256xf32>
    %243 = arith.select %237, %242, %234 : vector<4x256xi1>, vector<4x256xf32>
    %c0_160 = arith.constant 0 : index
    %c0_161 = arith.constant 0 : index
    %c0_162 = arith.constant 0 : index
    %244 = vector.load %arg10[%c0_160, %c0_161, %c0_162] : memref<1x4x256xf32, #tpu.memory_space<vmem>>, vector<1x4x256xf32>
    %245 = vector.shape_cast %244 : vector<1x4x256xf32> to vector<4x256xf32>
    %246 = vector.shape_cast %243 : vector<4x256xf32> to vector<1x4x256xf32>
    tpu.vector_store %arg10[%c0_160, %c0_161, %c0_162], %246 {strides = array<i32>} : memref<1x4x256xf32, #tpu.memory_space<vmem>>, vector<1x4x256xf32>,
    %c0_163 = arith.constant 0 : index
    %c0_164 = arith.constant 0 : index
    %c0_165 = arith.constant 0 : index
    %247 = vector.load %arg9[%c0_163, %c0_164, %c0_165] : memref<1x32x256xf32, #tpu.memory_space<vmem>>, vector<1x32x256xf32>
    %248 = vector.shape_cast %247 : vector<1x32x256xf32> to vector<32x256xf32>
    %c0_166 = arith.constant 0 : index
    %c0_167 = arith.constant 0 : index
    %c0_168 = arith.constant 0 : index
    %249 = vector.load %arg11[%c0_166, %c0_167, %c0_168] : memref<1x36x256xf32, #tpu.memory_space<vmem>>, vector<1x32x256xf32>
    %250 = vector.shape_cast %249 : vector<1x32x256xf32> to vector<32x256xf32>
    %251 = vector.shape_cast %248 : vector<32x256xf32> to vector<1x32x256xf32>
    tpu.vector_store %arg11[%c0_166, %c0_167, %c0_168], %251 {strides = array<i32>} : memref<1x36x256xf32, #tpu.memory_space<vmem>>, vector<1x32x256xf32>,
    %c0_169 = arith.constant 0 : index
    %c32 = arith.constant 32 : index
    %c0_170 = arith.constant 0 : index
    %252 = vector.load %arg11[%c0_169, %c32, %c0_170] : memref<1x36x256xf32, #tpu.memory_space<vmem>>, vector<1x4x256xf32>
    %253 = vector.shape_cast %252 : vector<1x4x256xf32> to vector<4x256xf32>
    %254 = vector.shape_cast %243 : vector<4x256xf32> to vector<1x4x256xf32>
    tpu.vector_store %arg11[%c0_169, %c32, %c0_170], %254 {strides = array<i32>} : memref<1x36x256xf32, #tpu.memory_space<vmem>>, vector<1x4x256xf32>,
    return
  }
  func.func @transform_0(%arg0: i32, %arg1: i32) -> i32 {
    %c0_i32 = arith.constant 0 : i32
    %c0_i32_0 = arith.constant 0 : i32
    return %c0_i32 : i32
  }
  func.func @transform_1(%arg0: i32, %arg1: i32) -> (i32, i32, i32) {
    %c0_i32 = arith.constant 0 : i32
    %c0_i32_0 = arith.constant 0 : i32
    %c0_i32_1 = arith.constant 0 : i32
    %c0_i32_2 = arith.constant 0 : i32
    return %c0_i32, %c0_i32_0, %c0_i32_1 : i32, i32, i32
  }
  func.func @transform_2(%arg0: i32, %arg1: i32) -> (i32, i32) {
    %c0_i32 = arith.constant 0 : i32
    %c0_i32_0 = arith.constant 0 : i32
    %c0_i32_1 = arith.constant 0 : i32
    return %c0_i32, %c0_i32_0 : i32, i32
  }
  func.func @transform_3(%arg0: i32, %arg1: i32) -> (i32, i32, i32) {
    %c0_i32 = arith.constant 0 : i32
    %c0_i32_0 = arith.constant 0 : i32
    %c0_i32_1 = arith.constant 0 : i32
    %c0_i32_2 = arith.constant 0 : i32
    return %c0_i32, %c0_i32_0, %c0_i32_1 : i32, i32, i32
  }
  func.func @transform_4(%arg0: i32, %arg1: i32) -> (i32, i32) {
    %c0_i32 = arith.constant 0 : i32
    %c0_i32_0 = arith.constant 0 : i32
    %c0_i32_1 = arith.constant 0 : i32
    return %c0_i32, %c0_i32_0 : i32, i32
  }
  func.func @transform_5(%arg0: i32, %arg1: i32) -> (i32, i32) {
    %c0_i32 = arith.constant 0 : i32
    %c0_i32_0 = arith.constant 0 : i32
    %c0_i32_1 = arith.constant 0 : i32
    return %c0_i32, %c0_i32_0 : i32, i32
  }
  func.func @transform_6(%arg0: i32, %arg1: i32) -> (i32, i32) {
    %c0_i32 = arith.constant 0 : i32
    %c0_i32_0 = arith.constant 0 : i32
    %c0_i32_1 = arith.constant 0 : i32
    return %c0_i32, %c0_i32_0 : i32, i32
  }
  func.func @transform_7(%arg0: i32, %arg1: i32) -> (i32, i32, i32) {
    %c0_i32 = arith.constant 0 : i32
    %c0_i32_0 = arith.constant 0 : i32
    return %arg0, %c0_i32, %arg1 : i32, i32, i32
  }
  func.func @transform_8(%arg0: i32, %arg1: i32) -> (i32, i32, i32) {
    %c0_i32 = arith.constant 0 : i32
    %c0_i32_0 = arith.constant 0 : i32
    return %arg0, %c0_i32, %arg1 : i32, i32, i32
  }
  func.func @transform_9(%arg0: i32, %arg1: i32) -> (i32, i32, i32) {
    %c0_i32 = arith.constant 0 : i32
    %c0_i32_0 = arith.constant 0 : i32
    return %arg0, %c0_i32, %arg1 : i32, i32, i32
  }
}

</mosaic_0001>

<bundles_post_ra>
// kernel: _lambda_.1
= control target key start
LH: loop header
LB: loop body
LE: loop exit
PB: predicated region body
PF: predicated region fallthrough
CT: control target
= control target key end

     0   :  { %15 = vsyncpa [#allocation5], 0  ;;  %s3761_s30 = smov 0   ;;  %s3763_s10 = smov 0   ;;  %s4870_s0 = inlined_call_operand.vmem [shape: f32[2], index: 0, kind: input, shape index: {}]   ;;  %s4871_s1 = inlined_call_operand.vmem [shape: f32[9,16,32], index: 1, kind: input, shape index: {}]   ;;  %s4872_s2 = inlined_call_operand.vmem [shape: f32[16,1], index: 2, kind: input, shape index: {}]   ;;  %s4873_s3 = inlined_call_operand.vmem [shape: f32[9,16,16], index: 3, kind: input, shape index: {}]   ;;  %s4874_s4 = inlined_call_operand.vmem [shape: f32[16,1], index: 4, kind: input, shape index: {}]   ;;  %s4875_s5 = inlined_call_operand.vmem [shape: f32[4,16], index: 5, kind: input, shape index: {}]   ;;  %s4876_s6 = inlined_call_operand.vmem [shape: f32[4,1], index: 6, kind: input, shape index: {}]   ;;  %s4877_s7 = inlined_call_operand.vmem [shape: f32[2,32,256], index: 7, kind: input, shape index: {}]   ;;  %s4878_s8 = inlined_call_operand.vmem [shape: f32[2,4,256], index: 8, kind: output, shape index: {0}]   ;;  %s4879_s9 = inlined_call_operand.vmem [shape: f32[2,36,256], index: 9, kind: output, shape index: {1}]  }
   0x1   :  { %s3765_s11 = smov 0  }
   0x2 LB: > { %s2976_s12 = sadd.s32 4294967295, %s3692_s11   ;;  %s33_s13 = sadd.s32 1, %s3688_s10  ;;  %s3692_s11 = sphi %s3765_s11, %s21_s11   ;;  %s3688_s10 = sphi %s3763_s10, %s4881_s10   ;;  %s3684_s30 = sphi %s3761_s30, %s4880_s30  }
   0x3   : > { %p35_p0 = scmp.ge.s32.totalorder %s33_s13, 2  ;;  %p2978_p1 = scmp.ge.s32.totalorder %s3692_s11, 1 }
   0x4   : > { %p269_p2 = scmp.lt.s32.totalorder %s3692_s11, 3  ;;  %p3132_p4 = scmp.eq.s32.totalorder %s2976_s12, 0 }
   0x5   : > { %s4883_s13 = smov (%p35_p0, %s33_s13), 0  ;;  %s281_s16 = sshll.u32 %s4870_s0, 4  ;;  %s282_s16 = int_to_ptr.vmem [resolvable:$true] %s281_s16 }
   0x6   : > { %p270_p3 = pnand %p2978_p1, %p269_p2  ;;  %s3694_s17 = smov [#allocation4]  }
   0x8   : > { %p3128_p5 = pneg %p270_p3  ;;  %325 = sbr.rel (%p270_p3) target bundleno = 1245 (0x4dd), region = 52 }
   0xa   : > { %p3129_p6 = pnand %p3132_p4, %p3128_p5 }
   0xc   : > { %3131 = dma.vmem_to_smem (!%p3129_p6), %s282_s16, 16, %s3694_s17, [#allocation5]  }
   0xd   : > { %3679 = dma.done.wait (%p3132_p4), [#allocation5], 16  }
   0xe   : > { %3681 = vsyncadd (%p3132_p4), [#allocation5], 4294967280 }
   0xf   : > { %332 = sfence }
  0x10   : > { %p381_p7 = scmp.lt.s32.totalorder %s3684_s30, 1  ;;  %vm415_vm0 = vcmask 589344   ;;  %vm488_vm1 = vcmask 556032   ;;  %v3695_v0 = vmov 0.0   ;;  %s3696_s22 = smov 100   ;;  %vm410_vm2 = vcmask 31744  }
  0x11   : > { %418 = vst.msk [vmem:[#allocation2 + $0x58] sm:$0xff] %vm415_vm0, %v3695_v0  ;;  %s3697_s23 = smov 62   ;;  %s3698_s24 = smov 92   ;;  %vm469_vm3 = vcmask 1048352   ;;  %vm482_vm4 = vcmask 818208   ;;  %vm452_vm5 = vcmask 818176  }
  0x12   : > { %s4885_s30 = smov (!%p381_p7, %s3684_s30), 1  ;;  %419 = vst.msk [vmem:[#allocation2 + $0x78] sm:$0xff] %vm415_vm0, %v3695_v0  ;;  %s3699_s25 = smov 94   ;;  %vm605_vm6 = vcmask 769024   ;;  %vm630_vm7 = vcmask 261120   ;;  %vm738_vm8 = vcmask 1031168  }
  0x13   : > { %493 = vst.msk [vmem:[#allocation2 + $0x58] sm:$0xff] %vm488_vm1, %v3695_v0  ;;  %s3117_s18 = sshll.u32 %s4885_s30, 6  ;;  %s3700_s26 = smov 126   ;;  %vm873_vm9 = vcmask 506880   ;;  %vm1047_vm10 = vcmask 752640   ;;  %vm1179_vm11 = vcmask 1014784  }
  0x14   : > { %495 = vst.msk [vmem:[#allocation2 + $0x78] sm:$0xff] %vm488_vm1, %v3695_v0  ;;  %s3795_s21 = scalar_lea.vmem %s4877_s7, %s3117_s18  ;;  %s3701_s27 = smov 124   ;;  %vm1464_vm12 = vcmask 736256   ;;  %vm1314_vm13 = vcmask 490496   ;;  %vm1596_vm14 = vcmask 998400   ;;  %vm1731_vm15 = vcmask 474112  }
  0x15   : > { %416 = vst.msk [vmem:[#allocation2 + $0x18] sm:$0xff] %vm415_vm0, %v3695_v0  ;;  %v427_v1 = vld [vmem:[%s3795_s21 + $0x38] sm:$0xff]  ;;  %v426_v3 = vld [vmem:[%s3795_s21 + $0x30] sm:$0xff]  ;;  %v425_v4 = vld [vmem:[%s3795_s21 + $0x28] sm:$0xff]  ;;  %s3702_s28 = smov 60   ;;  %s3703_s29 = smov 90  }
  0x16   : > { %v423_v2 = vld [vmem:[%s3795_s21 + $0x18] sm:$0xff]  ;;  %417 = vst.msk [vmem:[#allocation2 + $0x38] sm:$0xff] %vm415_vm0, %v3695_v0  ;;  %450 = vrot.lane.b32.xlu0 %v427_v1, %s3696_s22  ;;  %448 = vrot.lane.b32.xlu2 %v426_v3, %s3696_s22  ;;  %v421_v5 = vld [vmem:[%s3795_s21 + $0x8] sm:$0xff]  ;;  %s3704_s12 = smov 122   ;;  %s3705_s18 = smov 58  }
  0x17   : > { %442 = vrot.lane.b32.xlu1 %v423_v2, %s3696_s22  ;;  %489 = vst.msk [vmem:[#allocation2 + $0x18] sm:$0xff] %vm488_vm1, %v3695_v0  ;;  %v424_v6 = vld [vmem:[%s3795_s21 + $0x20] sm:$0xff]  ;;  %v422_v9 = vld [vmem:[%s3795_s21 + $0x10] sm:$0xff]  ;;  %s3707_s14 = smov 4   ;;  %s3708_s15 = smov 64  }
  0x18   : > { %491 = vst.msk [vmem:[#allocation2 + $0x38] sm:$0xff] %vm488_vm1, %v3695_v0  ;;  %v420_v10 = vld [vmem:[%s3795_s21] sm:$0xff]  ;;  %s3709_s16 = smov 56   ;;  %s3710_s17 = smov 120  }
  0x19   : > { %414 = vst.msk [vmem:[#allocation2 + $0x60] sm:$0xff] %vm410_vm2, %v3695_v0 }
  0x1a   : > { %v549_v7 = vld [vmem:[#allocation2 + $0x58] sm:$0xff]  ;;  %411 = vst.msk [vmem:[#allocation2] sm:$0xff] %vm410_vm2, %v3695_v0 }
  0x1b   : > { %v553_v8 = vld [vmem:[#allocation2 + $0x78] sm:$0xff]  ;;  %412 = vst.msk [vmem:[#allocation2 + $0x20] sm:$0xff] %vm410_vm2, %v3695_v0 }
  0x1c   : > { %v3811_v11 = vpack.i.bf16 %v549_v7, %v553_v8  ;;  %413 = vst.msk [vmem:[#allocation2 + $0x40] sm:$0xff] %vm410_vm2, %v3695_v0 }
  0x1d   : > { %1905 = vst.msk [vmem:[#allocation3] sm:$0xff] %vm410_vm2, %v3695_v0 }
  0x1e   : > { %446 = vrot.lane.b32.xlu0 %v425_v4, %s3696_s22  ;;  %444 = vrot.lane.b32.xlu2 %v424_v6, %s3696_s22  ;;  %v541_v12 = vld [vmem:[#allocation2 + $0x18] sm:$0xff]  ;;  %1906 = vst.msk [vmem:[#allocation3 + $0x20] sm:$0xff] %vm410_vm2, %v3695_v0 }
  0x1f   : > { %438 = vrot.lane.b32.xlu1 %v421_v5, %s3696_s22  ;;  %v545_v13 = vld [vmem:[#allocation2 + $0x38] sm:$0xff] }
  0x20   : > { %v3815_v14 = vpack.i.bf16 %v541_v12, %v545_v13 }
  0x26   : > { %440 = vrot.lane.b32.xlu0 %v422_v9, %s3696_s22  ;;  %3176 = vrot.lane.b32.xlu2 %v3811_v11, %s3697_s23 }
  0x27   : > { %436 = vrot.lane.b32.xlu1 %v420_v10, %s3696_s22 }
  0x2e   : > { %3186 = vrot.lane.b32.xlu2 %v3811_v11, %s3698_s24 }
  0x2f   : > { %3181 = vrot.lane.b32.xlu1 %v3815_v14, %s3697_s23 }
  0x37   : > { %3191 = vrot.lane.b32.xlu1 %v3815_v14, %s3698_s24 }
  0x70   : > { %v449_v15 = vpop.permute.xlu2 %448 }
  0x71   : > { %479 = vst.msk [vmem:[#allocation2 + $0x60] sm:$0xff] %vm469_vm3, %v449_v15 }
  0x72   : > { %486 = vst.msk [vmem:[#allocation2 + $0x60] sm:$0xff] %vm482_vm4, %v3695_v0 }
  0x78   : > { %v445_v16 = vpop.permute.xlu2 %444 }
  0x79   : > { %476 = vst.msk [vmem:[#allocation2 + $0x40] sm:$0xff] %vm469_vm3, %v445_v16  ;;  %v550_v37 = vld [vmem:[#allocation2 + $0x60] sm:$0xff] }
  0x7a   : > { %485 = vst.msk [vmem:[#allocation2 + $0x40] sm:$0xff] %vm482_vm4, %v3695_v0 }
  0x80   : > { %v3941_v50 = vpop.permute.xlu2 %3176 }
  0x81   : > { %v3872_v33 = vld [vmem:[#allocation2 + $0x40] sm:$0xff] }
  0x82   : > { %v3929_v47 = vpack.i.bf16 %v3872_v33, %v550_v37 }
  0x88   : > { %v451_v17 = vpop.permute.xlu0 %450  ;;  %v3953_v52 = vpop.permute.xlu2 %3186 }
  0x89   : > { %v443_v18 = vpop.permute.xlu1 %442  ;;  %481 = vst.msk [vmem:[#allocation2 + $0x70] sm:$0xff] %vm452_vm5, %v451_v17  ;;  %v3843_v19 = vsel %vm452_vm5, %v449_v15, %v451_v17 }
  0x8a   : > { %494 = vst.msk [vmem:[#allocation2 + $0x70] sm:$0xff] %vm469_vm3, %v3695_v0  ;;  %v3892_v38 = vpack.i.bf16 %v3843_v19, %v550_v37  ;;  %v3956_v53 = vpack.i.bf16 %v550_v37, %v3843_v19 }
  0x8b   : > { %475 = vst.msk [vmem:[#allocation2 + $0x30] sm:$0xff] %vm452_vm5, %v443_v18 }
  0x8c   : > { %490 = vst.msk [vmem:[#allocation2 + $0x30] sm:$0xff] %vm469_vm3, %v3695_v0 }
  0x90   : > { %v447_v20 = vpop.permute.xlu0 %446 }
  0x91   : > { %v439_v21 = vpop.permute.xlu1 %438  ;;  %478 = vst.msk [vmem:[#allocation2 + $0x50] sm:$0xff] %vm452_vm5, %v447_v20  ;;  %v3852_v22 = vsel %vm452_vm5, %v445_v16, %v447_v20  ;;  %v552_v23 = vld [vmem:[#allocation2 + $0x70] sm:$0xff] }
  0x92   : > { %492 = vst.msk [vmem:[#allocation2 + $0x50] sm:$0xff] %vm469_vm3, %v3695_v0  ;;  %v3856_v24 = vpack.i.bf16 %v553_v8, %v552_v23  ;;  %v3883_v36 = vpack.i.bf16 %v3852_v22, %v3872_v33  ;;  %v3300_v44 = vpack.i.bf16 %v552_v23, %v3843_v19  ;;  %v3985_v62 = vpack.i.bf16 %v3872_v33, %v3852_v22 }
  0x93   : > { %472 = vst.msk [vmem:[#allocation2 + $0x10] sm:$0xff] %vm452_vm5, %v439_v21  ;;  %v544_v25 = vld [vmem:[#allocation2 + $0x30] sm:$0xff] }
  0x94   : > { %3196 = vrot.lane.b32.xlu2 %v3856_v24, %s3699_s25  ;;  %487 = vst.msk [vmem:[#allocation2 + $0x10] sm:$0xff] %vm469_vm3, %v3695_v0  ;;  %v3863_v26 = vpack.i.bf16 %v545_v13, %v544_v25 }
  0x96   : > { %3206 = vrot.lane.b32.xlu1 %v3863_v26, %s3699_s25 }
  0x98   : > { %v441_v27 = vpop.permute.xlu0 %440 }
  0x99   : > { %v437_v28 = vpop.permute.xlu1 %436  ;;  %v454_v29 = vsel %vm452_vm5, %v441_v27, %v443_v18  ;;  %473 = vst.msk [vmem:[#allocation2 + $0x20] sm:$0xff] %vm469_vm3, %v441_v27  ;;  %v548_v30 = vld [vmem:[#allocation2 + $0x50] sm:$0xff] }
  0x9a   : > { %v453_v31 = vsel %vm452_vm5, %v437_v28, %v439_v21  ;;  %v3870_v32 = vpack.i.bf16 %v549_v7, %v548_v30  ;;  %484 = vst.msk [vmem:[#allocation2 + $0x20] sm:$0xff] %vm482_vm4, %v3695_v0  ;;  %v3912_v43 = vpack.i.bf16 %v548_v30, %v552_v23  ;;  %v3921_v45 = vpack.i.bf16 %v548_v30, %v3852_v22 }
  0x9b   : > { %470 = vst.msk [vmem:[#allocation2] sm:$0xff] %vm469_vm3, %v437_v28  ;;  %v540_v34 = vld [vmem:[#allocation2 + $0x10] sm:$0xff]  ;;  %v3933_v48 = vpack.i.bf16 %v544_v25, %v454_v29  ;;  %vm1907_vm5 = vcmask 64544  }
  0x9c   : > { %3201 = vrot.lane.b32.xlu0 %v3870_v32, %s3699_s25  ;;  %v3879_v35 = vpack.i.bf16 %v541_v12, %v540_v34  ;;  %483 = vst.msk [vmem:[#allocation2] sm:$0xff] %vm482_vm4, %v3695_v0  ;;  %v3926_v46 = vpack.i.bf16 %v540_v34, %v544_v25  ;;  %v3939_v49 = vpack.i.bf16 %v540_v34, %v453_v31 }
  0x9d   : > { %1909 = vst.msk [vmem:[#allocation3 + $0x38] sm:$0xff] %vm1907_vm5, %v3695_v0 }
  0x9e   : > { %3211 = vrot.lane.b32.xlu2 %v3879_v35, %s3699_s25  ;;  %3221 = vrot.lane.b32.xlu1 %v3883_v36, %s3699_s25  ;;  %1908 = vst.msk [vmem:[#allocation3 + $0x18] sm:$0xff] %vm1907_vm5, %v3695_v0  ;;  %vm2519_vm5 = vcmask 982016  }
  0xa1   : > { %v542_v39 = vld [vmem:[#allocation2 + $0x20] sm:$0xff]  ;;  %v3975_v60 = vpop.permute.xlu1 %3181 }
  0xa2   : > { %v3894_v40 = vpack.i.bf16 %v454_v29, %v542_v39  ;;  %v3958_v54 = vpack.i.bf16 %v542_v39, %v454_v29 }
  0xa3   : > { %v538_v41 = vld [vmem:[#allocation2] sm:$0xff] }
  0xa4   : > { %3216 = vrot.lane.b32.xlu0 %v3892_v38, %s3699_s25  ;;  %v3230_v42 = vpack.i.bf16 %v453_v31, %v538_v41  ;;  %v3949_v51 = vpack.i.bf16 %v538_v41, %v542_v39  ;;  %v3966_v55 = vpack.i.bf16 %v538_v41, %v453_v31 }
  0xa6   : > { %3226 = vrot.lane.b32.xlu2 %v3894_v40, %s3699_s25  ;;  %3236 = vrot.lane.b32.xlu1 %v3892_v38, %s3700_s26 }
  0xa9   : > { %v3992_v63 = vpop.permute.xlu1 %3191 }
  0xac   : > { %3231 = vrot.lane.b32.xlu0 %v3230_v42, %s3699_s25  ;;  %s3110_s25 = sld [smem:[#allocation4 + $0x1]] }
  0xae   : > { %3241 = vrot.lane.b32.xlu2 %v3883_v36, %s3700_s26  ;;  %3251 = vrot.lane.b32.xlu1 %v3894_v40, %s3700_s26 }
  0xb4   : > { %3246 = vrot.lane.b32.xlu0 %v3892_v38, %s3697_s23 }
  0xb6   : > { %3256 = vrot.lane.b32.xlu2 %v3883_v36, %s3697_s23  ;;  %3266 = vrot.lane.b32.xlu1 %v3894_v40, %s3697_s23 }
  0xbc   : > { %3261 = vrot.lane.b32.xlu0 %v3230_v42, %s3700_s26 }
  0xbe   : > { %3271 = vrot.lane.b32.xlu2 %v3856_v24, %s3700_s26  ;;  %3281 = vrot.lane.b32.xlu1 %v3870_v32, %s3700_s26 }
  0xc4   : > { %3276 = vrot.lane.b32.xlu0 %v3230_v42, %s3697_s23 }
  0xc6   : > { %3286 = vrot.lane.b32.xlu2 %v3863_v26, %s3700_s26  ;;  %3296 = vrot.lane.b32.xlu1 %v3912_v43, %s3697_s23 }
  0xcc   : > { %3291 = vrot.lane.b32.xlu0 %v3879_v35, %s3700_s26 }
  0xce   : > { %3301 = vrot.lane.b32.xlu2 %v3300_v44, %s3698_s24  ;;  %3311 = vrot.lane.b32.xlu1 %v3921_v45, %s3698_s24 }
  0xd4   : > { %3306 = vrot.lane.b32.xlu0 %v3926_v46, %s3697_s23 }
  0xd6   : > { %3316 = vrot.lane.b32.xlu2 %v3933_v48, %s3698_s24  ;;  %3326 = vrot.lane.b32.xlu1 %v3929_v47, %s3698_s24 }
  0xdc   : > { %3321 = vrot.lane.b32.xlu0 %v3939_v49, %s3698_s24 }
  0xde   : > { %3341 = vrot.lane.b32.xlu2 %v3870_v32, %s3701_s27  ;;  %3351 = vrot.lane.b32.xlu1 %v3879_v35, %s3701_s27 }
  0xe4   : > { %3331 = vrot.lane.b32.xlu0 %v3949_v51, %s3698_s24 }
  0xe6   : > { %3356 = vrot.lane.b32.xlu2 %v3956_v53, %s3701_s27  ;;  %3366 = vrot.lane.b32.xlu1 %v3958_v54, %s3701_s27 }
  0xec   : > { %3336 = vrot.lane.b32.xlu0 %v3856_v24, %s3701_s27 }
  0xee   : > { %v3197_v56 = vpop.permute.xlu2 %3196  ;;  %3381 = vrot.lane.b32.xlu1 %v3883_v36, %s3702_s28  ;;  %3371 = vrot.lane.b32.xlu2 %v3966_v55, %s3701_s27 }
  0xef   : > { %v3199_v57 = vunpack.i.h.bf16 %v3197_v56  ;;  %v3198_v58 = vunpack.i.l.bf16 %v3197_v56 }
  0xf1   : > { %v617_v59 = vsel %vm605_vm6, %v3198_v58, %v3199_v57 }
  0xf2   : > { %695 = vmatpush.msra.mxu2 %v617_v59 }
  0xf4   : > { %3346 = vrot.lane.b32.xlu0 %v3863_v26, %s3701_s27 }
  0xf6   : > { %3396 = vrot.lane.b32.xlu1 %v3883_v36, %s3703_s29  ;;  %3386 = vrot.lane.b32.xlu2 %v3892_v38, %s3703_s29  ;;  %v2988_v36 = vld [vmem:[%s4871_s1 + $0x30] sm:$0xff] }
  0xf8   : > { %v3981_v61 = vpop.permute.xlu2 %3211 }
  0xf9   : > { %v3214_v6 = vunpack.i.h.bf16 %v3981_v61  ;;  %v3213_v10 = vunpack.i.l.bf16 %v3981_v61 }
  0xfb   : > { %v608_v17 = vsel %vm605_vm6, %v3213_v10, %v3214_v6  ;;  %v2989_v6 = vld [vmem:[%s4871_s1 + $0x38] sm:$0xff] }
  0xfc   : > { %3361 = vrot.lane.b32.xlu0 %v3985_v62, %s3701_s27 }
  0xfe   : > { %3411 = vrot.lane.b32.xlu1 %v3856_v24, %s3702_s28  ;;  %3401 = vrot.lane.b32.xlu2 %v3230_v42, %s3702_s28 }
 0x100   : > { %v3994_v1 = vpop.permute.xlu2 %3226 }
 0x101   : > { %v3229_v23 = vunpack.i.h.bf16 %v3994_v1  ;;  %v3228_v25 = vunpack.i.l.bf16 %v3994_v1 }
 0x103   : > { %v609_v34 = vsel %vm605_vm6, %v3228_v25, %v3229_v23 }
 0x104   : > { %3376 = vrot.lane.b32.xlu0 %v3892_v38, %s3702_s28 }
 0x106   : > { %3426 = vrot.lane.b32.xlu1 %v3863_v26, %s3702_s28  ;;  %3416 = vrot.lane.b32.xlu2 %v3230_v42, %s3703_s29 }
 0x108   : > { %v4001_v2 = vpop.permute.xlu2 %3241  ;;  %v3207_v3 = vpop.permute.xlu1 %3206 }
 0x109   : > { %v3209_v4 = vunpack.i.h.bf16 %v3207_v3  ;;  %v3208_v7 = vunpack.i.l.bf16 %v3207_v3  ;;  %v3243_v56 = vunpack.i.l.bf16 %v4001_v2 }
 0x10b   : > { %v611_v16 = vsel %vm605_vm6, %v3208_v7, %v3209_v4 }
 0x10c   : > { %3391 = vrot.lane.b32.xlu0 %v3894_v40, %s3702_s28 }
 0x10e   : > { %v3202_v5 = vpop.permute.xlu0 %3201  ;;  %3441 = vrot.lane.b32.xlu1 %v3300_v44, %s3704_s12  ;;  %3431 = vrot.lane.b32.xlu2 %v3879_v35, %s3702_s28 }
 0x10f   : > { %v3204_v8 = vunpack.i.h.bf16 %v3202_v5  ;;  %v3203_v9 = vunpack.i.l.bf16 %v3202_v5 }
 0x110   : > { %v4010_v12 = vpop.permute.xlu2 %3256  ;;  %v3222_v13 = vpop.permute.xlu1 %3221 }
 0x111   : > { %v614_v15 = vsel %vm605_vm6, %v3203_v9, %v3204_v8  ;;  %v3224_v19 = vunpack.i.h.bf16 %v3222_v13  ;;  %v3223_v20 = vunpack.i.l.bf16 %v3222_v13  ;;  %v3259_v8 = vunpack.i.h.bf16 %v4010_v12 }
 0x112   : > { %696 = vmatpush.msra.mxu2 %v614_v15 }
 0x113   : > { %v612_v31 = vsel %vm605_vm6, %v3223_v20, %v3224_v19  ;;  %v613_v33 = vsel %vm605_vm6, %v3224_v19, %v3203_v9 }
 0x114   : > { %3406 = vrot.lane.b32.xlu0 %v3894_v40, %s3703_s29  ;;  %697 = vmatpush.msra.mxu2 %v611_v16 }
 0x116   : > { %v3217_v18 = vpop.permute.xlu0 %3216  ;;  %698 = vmatpush.msra.mxu2 %v608_v17  ;;  %3456 = vrot.lane.b32.xlu1 %v3933_v48, %s3704_s12  ;;  %v3244_v48 = vunpack.i.h.bf16 %v4001_v2 }
 0x117   : > { %3446 = vrot.lane.b32.xlu2 %v3926_v46, %s3703_s29  ;;  %v3219_v21 = vunpack.i.h.bf16 %v3217_v18  ;;  %v3218_v22 = vunpack.i.l.bf16 %v3217_v18  ;;  %2994 = vmatmul.msk.f32.vlgmr.msra.gmra.mxu2 %vm630_vm7, %v2988_v36  ;;  %v610_v46 = vsel %vm605_vm6, %v3229_v23, %v3208_v7 }
 0x118   : > { %v3272_v27 = vpop.permute.xlu2 %3271  ;;  %v3237_v28 = vpop.permute.xlu1 %3236  ;;  %v745_v7 = vsel %vm738_vm8, %v3243_v56, %v3244_v48  ;;  %v4154_v56 = vld [vmem:[%s4871_s1 + $0x60] sm:$0xff] }
 0x119   : > { %v615_v29 = vsel %vm605_vm6, %v3218_v22, %v3219_v21  ;;  %v616_v30 = vsel %vm605_vm6, %v3219_v21, %v3198_v58  ;;  %v3274_v37 = vunpack.i.h.bf16 %v3272_v27  ;;  %v3239_v38 = vunpack.i.h.bf16 %v3237_v28 }
 0x11a   : > { %649 = vmatpush.msra.mxu0 %v615_v29  ;;  %3119 = vmatpush.msra.mxu3 %v615_v29  ;;  %v3238_v39 = vunpack.i.l.bf16 %v3237_v28  ;;  %v3273_v41 = vunpack.i.l.bf16 %v3272_v27 }
 0x11b   : > { %672 = vmatpush.msra.mxu1 %v616_v30 }
 0x11c   : > { %3421 = vrot.lane.b32.xlu0 %v3870_v32, %s3702_s28  ;;  %650 = vmatpush.msra.mxu0 %v612_v31  ;;  %v750_v1 = vsel %vm738_vm8, %v3273_v41, %v3274_v37  ;;  %v749_v5 = vsel %vm738_vm8, %v3239_v38, %v3273_v41 }
 0x11d   : > { %3120 = vmatpush.msra.mxu3 %v612_v31  ;;  %673 = vmatpush.msra.mxu1 %v613_v33 }
 0x11e   : > { %v3232_v40 = vpop.permute.xlu0 %3231  ;;  %651 = vmatpush.msra.mxu0 %v609_v34  ;;  %3471 = vrot.lane.b32.xlu1 %v3811_v11, %s3703_s29 }
 0x11f   : > { %3461 = vrot.lane.b32.xlu2 %v3939_v49, %s3704_s12  ;;  %v3234_v42 = vunpack.i.h.bf16 %v3232_v40  ;;  %v3233_v44 = vunpack.i.l.bf16 %v3232_v40  ;;  %3121 = vmatpush.msra.mxu3 %v609_v34  ;;  %v748_v49 = vsel %vm738_vm8, %v3238_v39, %v3239_v38 }
 0x120   : > { %674 = vmatpush.msra.mxu1 %v610_v46  ;;  %v4041_v57 = vpop.permute.xlu2 %3286  ;;  %v4043_v58 = vpop.permute.xlu1 %3251  ;;  %2995 = vmatmul.msk.f32.gmra.mxu2 %vm630_vm7, %v2989_v6 }
 0x121   : > { %v606_v59 = vsel %vm605_vm6, %v3233_v44, %v3234_v42  ;;  %v607_v61 = vsel %vm605_vm6, %v3234_v42, %v3213_v10  ;;  %v3254_v3 = vunpack.i.h.bf16 %v4043_v58  ;;  %v3253_v4 = vunpack.i.l.bf16 %v4043_v58 }
 0x122   : > { %652 = vmatpush.msra.mxu0 %v606_v59  ;;  %3122 = vmatpush.msra.mxu3 %v606_v59  ;;  %v3258_v10 = vunpack.i.l.bf16 %v4010_v12  ;;  %v3289_v25 = vunpack.i.h.bf16 %v4041_v57  ;;  %v3288_v30 = vunpack.i.l.bf16 %v4041_v57 }
 0x123   : > { %675 = vmatpush.msra.mxu1 %v607_v61  ;;  %2991 = vmatmul.msk.f32.vlgmr.msra.gmra.mxu3 %vm630_vm7, %v2989_v6  ;;  %v742_v15 = vsel %vm738_vm8, %v3253_v4, %v3254_v3 }
 0x124   : > { %781 = vmatpush.msrb.mxu3 %v748_v49  ;;  %804 = vmatpush.msrb.mxu0 %v749_v5  ;;  %v880_v19 = vsel %vm873_vm9, %v3258_v10, %v3259_v8  ;;  %v744_v34 = vsel %vm738_vm8, %v3288_v30, %v3289_v25  ;;  %v3178_v49 = vunpack.i.l.bf16 %v3941_v50 }
 0x125   : > { %3436 = vrot.lane.b32.xlu0 %v3912_v43, %s3703_s29  ;;  %827 = vmatpush.msrb.mxu1 %v750_v1  ;;  %v3179_v1 = vunpack.i.h.bf16 %v3941_v50  ;;  %v4181_v50 = vld [vmem:[%s4871_s1 + $0x68] sm:$0xff] }
 0x126   : > { %782 = vmatpush.msrb.mxu3 %v745_v7  ;;  %v4061_v9 = vpop.permute.xlu0 %3246  ;;  %2990 = vmatmul.msk.f32.vlgmr.msra.gmra.mxu0 %vm630_vm7, %v2988_v36 }
 0x127   : > { %3486 = vrot.lane.b32.xlu1 %v3811_v11, %s3704_s12  ;;  %3476 = vrot.lane.b32.xlu2 %v3949_v51, %s3704_s12  ;;  %v3249_v43 = vunpack.i.h.bf16 %v4061_v9  ;;  %v3248_v13 = vunpack.i.l.bf16 %v4061_v9 }
 0x128   : > { %783 = vmatpush.msrb.mxu3 %v742_v15  ;;  %2992 = vmatmul.msk.f32.vlgmr.msra.gmra.mxu1 %vm630_vm7, %v2988_v36  ;;  %v4076_v16 = vpop.permute.xlu2 %3301  ;;  %v4078_v17 = vpop.permute.xlu1 %3266  ;;  %v3183_v15 = vunpack.i.l.bf16 %v3975_v60 }
 0x129   : > { %v883_v11 = vsel %vm873_vm9, %v3248_v13, %v3249_v43  ;;  %v3269_v51 = vunpack.i.h.bf16 %v4078_v17  ;;  %v3268_v18 = vunpack.i.l.bf16 %v4078_v17  ;;  %v3304_v36 = vunpack.i.h.bf16 %v4076_v16 }
 0x12a   : > { %916 = vmatpush.msrb.mxu2 %v883_v11  ;;  %v3303_v37 = vunpack.i.l.bf16 %v4076_v16 }
 0x12b   : > { %v877_v20 = vsel %vm873_vm9, %v3268_v18, %v3269_v51 }
 0x12c   : > { %917 = vmatpush.msrb.mxu2 %v880_v19 }
 0x12d   : > { %3451 = vrot.lane.b32.xlu0 %v3921_v45, %s3704_s12  ;;  %v4103_v45 = vld [vmem:[%s4871_s1] sm:$0xff] }
 0x12e   : > { %v4092_v21 = vpop.permute.xlu0 %3261  ;;  %918 = vmatpush.msrb.mxu2 %v877_v20 }
 0x12f   : > { %3501 = vrot.lane.b32.xlu1 %v3870_v32, %s3705_s18  ;;  %3491 = vrot.lane.b32.xlu2 %v3856_v24, %s3705_s18  ;;  %v3264_v22 = vunpack.i.h.bf16 %v4092_v21  ;;  %v3263_v23 = vunpack.i.l.bf16 %v4092_v21 }
 0x130   : > { %2993 = vmatmul.msk.f32.gmra.mxu1 %vm630_vm7, %v2989_v6  ;;  %v4107_v27 = vpop.permute.xlu2 %3316  ;;  %v3282_v28 = vpop.permute.xlu1 %3281 }
 0x131   : > { %v739_v32 = vsel %vm738_vm8, %v3263_v23, %v3264_v22  ;;  %v3284_v29 = vunpack.i.h.bf16 %v3282_v28  ;;  %v3283_v24 = vunpack.i.l.bf16 %v3282_v28  ;;  %v3318_v12 = vunpack.i.l.bf16 %v4107_v27 }
 0x132   : > { %784 = vmatpush.msrb.mxu3 %v739_v32  ;;  %v3188_v32 = vunpack.i.l.bf16 %v3953_v52 }
 0x133   : > { %2996 = vmatmul.msk.f32.vlgmr.msrb.gmra.mxu3 %vm630_vm7, %v4103_v45  ;;  %v746_v31 = vsel %vm738_vm8, %v3244_v48, %v3283_v24  ;;  %v747_v33 = vsel %vm738_vm8, %v3283_v24, %v3284_v29  ;;  %v4149_v48 = vld [vmem:[%s4871_s1 + $0x8] sm:$0xff] }
 0x134   : > { %805 = vmatpush.msrb.mxu0 %v746_v31  ;;  %828 = vmatpush.msrb.mxu1 %v747_v33  ;;  %v1059_v24 = vsel %vm1047_vm10, %v3304_v36, %v3188_v32  ;;  %v3194_v31 = vunpack.i.h.bf16 %v3992_v63 }
 0x135   : > { %3466 = vrot.lane.b32.xlu0 %v3929_v47, %s3704_s12  ;;  %v743_v47 = vsel %vm738_vm8, %v3254_v3, %v3288_v30  ;;  %v3319_v3 = vunpack.i.h.bf16 %v4107_v27 }
 0x136   : > { %v4122_v38 = vpop.permute.xlu0 %3276  ;;  %806 = vmatpush.msrb.mxu0 %v743_v47  ;;  %829 = vmatpush.msrb.mxu1 %v744_v34  ;;  %v3193_v34 = vunpack.i.l.bf16 %v3992_v63 }
 0x137   : > { %3516 = vrot.lane.b32.xlu1 %v3956_v53, %s3705_s18  ;;  %3506 = vrot.lane.b32.xlu2 %v3863_v26, %s3705_s18  ;;  %v3279_v2 = vunpack.i.h.bf16 %v4122_v38  ;;  %v3278_v39 = vunpack.i.l.bf16 %v4122_v38  ;;  %v1058_v26 = vsel %vm1047_vm10, %v3303_v37, %v3304_v36  ;;  %v3012_v36 = vld [vmem:[%s4871_s1 + $0x40] sm:$0xff] }
 0x138   : > { %v4133_v40 = vpop.permute.xlu2 %3341  ;;  %v3297_v41 = vpop.permute.xlu1 %3296  ;;  %v1053_v63 = vsel %vm1047_vm10, %v3319_v3, %v3193_v34 }
 0x139   : > { %v874_v53 = vsel %vm873_vm9, %v3278_v39, %v3279_v2  ;;  %v3298_v42 = vunpack.i.l.bf16 %v3297_v41  ;;  %v3299_v44 = vunpack.i.h.bf16 %v3297_v41 }
 0x13a   : > { %919 = vmatpush.msrb.mxu2 %v874_v53 }
 0x13b   : > { %v884_v46 = vsel %vm873_vm9, %v3249_v43, %v3298_v42  ;;  %3004 = vmatmul.msk.f32.vlgmr.msrb.gmra.mxu2 %vm630_vm7, %v4154_v56  ;;  %2997 = vmatmul.msk.f32.gmra.mxu3 %vm630_vm7, %v4149_v48  ;;  %v881_v58 = vsel %vm873_vm9, %v3259_v8, %v3299_v44  ;;  %v885_v8 = vsel %vm873_vm9, %v3298_v42, %v3178_v49 }
 0x13c   : > { %1113 = vmatpush.msra.mxu2 %v1058_v26  ;;  %939 = vmatpush.msra.mxu3 %v884_v46  ;;  %v882_v10 = vsel %vm873_vm9, %v3299_v44, %v3179_v1  ;;  %v1052_v43 = vsel %vm1047_vm10, %v3318_v12, %v3319_v3 }
 0x13d   : > { %3481 = vrot.lane.b32.xlu0 %v3815_v14, %s3703_s29 }
 0x13e   : > { %v3292_v57 = vpop.permute.xlu0 %3291  ;;  %940 = vmatpush.msra.mxu3 %v881_v58 }
 0x13f   : > { %3531 = vrot.lane.b32.xlu1 %v3966_v55, %s3705_s18  ;;  %3521 = vrot.lane.b32.xlu2 %v3985_v62, %s3705_s18  ;;  %v3294_v59 = vunpack.i.h.bf16 %v3292_v57  ;;  %v3293_v61 = vunpack.i.l.bf16 %v3292_v57  ;;  %v3344_v57 = vunpack.i.h.bf16 %v4133_v40 }
 0x140   : > { %v4170_v4 = vpop.permute.xlu2 %3356  ;;  %v3312_v5 = vpop.permute.xlu1 %3311 }
 0x141   : > { %v740_v55 = vsel %vm738_vm8, %v3264_v22, %v3293_v61  ;;  %v741_v62 = vsel %vm738_vm8, %v3293_v61, %v3294_v59  ;;  %v3314_v6 = vunpack.i.h.bf16 %v3312_v5  ;;  %v3313_v7 = vunpack.i.l.bf16 %v3312_v5 }
 0x142   : > { %807 = vmatpush.msrb.mxu0 %v740_v55  ;;  %830 = vmatpush.msrb.mxu1 %v741_v62  ;;  %v3359_v18 = vunpack.i.h.bf16 %v4170_v4  ;;  %v3358_v19 = vunpack.i.l.bf16 %v4170_v4 }
 0x143   : > { %3000 = vmatmul.msk.f32.vlgmr.msrb.gmra.mxu1 %vm630_vm7, %v4103_v45  ;;  %v1055_v9 = vsel %vm1047_vm10, %v3313_v7, %v3314_v6  ;;  %2998 = vmatmul.msk.f32.vlgmr.msrb.gmra.mxu0 %vm630_vm7, %v4103_v45  ;;  %v3184_v45 = vunpack.i.h.bf16 %v3975_v60 }
 0x144   : > { %962 = vmatpush.msra.mxu0 %v885_v8  ;;  %1114 = vmatpush.msra.mxu2 %v1055_v9  ;;  %v1189_v30 = vsel %vm1179_vm11, %v3359_v18, %v3358_v19 }
 0x145   : > { %3496 = vrot.lane.b32.xlu0 %v3815_v14, %s3704_s12  ;;  %3005 = vmatmul.msk.f32.gmra.mxu2 %vm630_vm7, %v4181_v50  ;;  %s1885_s12 = sld [smem:[#allocation4]] }
 0x146   : > { %963 = vmatpush.msra.mxu0 %v882_v10  ;;  %v3307_v13 = vpop.permute.xlu0 %3306  ;;  %1115 = vmatpush.msra.mxu2 %v1052_v43 }
 0x147   : > { %v3309_v14 = vunpack.i.h.bf16 %v3307_v13  ;;  %v3308_v11 = vunpack.i.l.bf16 %v3307_v13 }
 0x148   : > { %v4199_v20 = vpop.permute.xlu2 %3371  ;;  %v3327_v21 = vpop.permute.xlu1 %3326 }
 0x149   : > { %v878_v22 = vsel %vm873_vm9, %v3269_v51, %v3308_v11  ;;  %v879_v23 = vsel %vm873_vm9, %v3308_v11, %v3183_v15  ;;  %v3329_v25 = vunpack.i.h.bf16 %v3327_v21  ;;  %v3328_v28 = vunpack.i.l.bf16 %v3327_v21  ;;  %v3010_v15 = vld [vmem:[%s4871_s1 + $0x10] sm:$0xff] }
 0x14a   : > { %941 = vmatpush.msra.mxu3 %v878_v22  ;;  %964 = vmatpush.msra.mxu0 %v879_v23  ;;  %v875_v29 = vsel %vm873_vm9, %v3279_v2, %v3309_v14  ;;  %v876_v60 = vsel %vm873_vm9, %v3309_v14, %v3184_v45  ;;  %v3189_v51 = vunpack.i.h.bf16 %v3953_v52  ;;  %v3374_v45 = vunpack.i.h.bf16 %v4199_v20 }
 0x14b   : > { %3001 = vmatmul.msk.f32.gmra.mxu1 %vm630_vm7, %v4149_v48  ;;  %v1057_v17 = vsel %vm1047_vm10, %v3328_v28, %v3303_v37  ;;  %v1054_v33 = vsel %vm1047_vm10, %v3329_v25, %v3313_v7  ;;  %2999 = vmatmul.msk.f32.gmra.mxu0 %vm630_vm7, %v4149_v48  ;;  %v3373_v25 = vunpack.i.l.bf16 %v4199_v20 }
 0x14c   : > { %942 = vmatpush.msra.mxu3 %v875_v29  ;;  %1090 = vmatpush.msra.mxu1 %v1057_v17  ;;  %v1056_v16 = vsel %vm1047_vm10, %v3314_v6, %v3189_v51 }
 0x14d   : > { %3511 = vrot.lane.b32.xlu0 %v3879_v35, %s3705_s18  ;;  %965 = vmatpush.msra.mxu0 %v876_v60 }
 0x14e   : > { %1136 = vmatpush.msrb.mxu3 %v1059_v24  ;;  %v3322_v35 = vpop.permute.xlu0 %3321  ;;  %1091 = vmatpush.msra.mxu1 %v1054_v33 }
 0x14f   : > { %1222 = vmatpush.msrb.mxu0 %v1189_v30  ;;  %v3324_v52 = vunpack.i.h.bf16 %v3322_v35  ;;  %v3323_v37 = vunpack.i.l.bf16 %v3322_v35  ;;  %3006 = vmatmul.msk.f32.vlgmr.msra.gmra.mxu3 %vm630_vm7, %v4154_v56  ;;  %v1180_v30 = vsel %vm1179_vm11, %v3374_v45, %v3373_v25 }
 0x150   : > { %1137 = vmatpush.msrb.mxu3 %v1056_v16  ;;  %v4236_v38 = vpop.permute.xlu1 %3351  ;;  %v4243_v39 = vpop.permute.xlu2 %3386  ;;  %v3011_v16 = vld [vmem:[%s4871_s1 + $0x18] sm:$0xff] }
 0x151   : > { %v1049_v47 = vsel %vm1047_vm10, %v3323_v37, %v3324_v52  ;;  %v1050_v2 = vsel %vm1047_vm10, %v3324_v52, %v3194_v31  ;;  %v3354_v3 = vunpack.i.h.bf16 %v4236_v38  ;;  %v3353_v62 = vunpack.i.l.bf16 %v4236_v38 }
 0x152   : > { %1138 = vmatpush.msrb.mxu3 %v1053_v63  ;;  %1116 = vmatpush.msra.mxu2 %v1049_v47  ;;  %v3389_v6 = vunpack.i.h.bf16 %v4243_v39  ;;  %v3388_v7 = vunpack.i.l.bf16 %v4243_v39 }
 0x153   : > { %3016 = vmatmul.msk.f32.vlgmr.msra.gmra.mxu2 %vm630_vm7, %v3012_v36  ;;  %3008 = vmatmul.msk.f32.vlgmr.msra.gmra.mxu0 %vm630_vm7, %v4154_v56  ;;  %v3343_v56 = vunpack.i.l.bf16 %v4133_v40  ;;  %v1182_v9 = vsel %vm1179_vm11, %v3353_v62, %v3354_v3  ;;  %v1181_v20 = vsel %vm1179_vm11, %v3373_v25, %v3353_v62  ;;  %v3027_v62 = vld [vmem:[%s4871_s1 + $0x78] sm:$0xff] }
 0x154   : > { %1139 = vmatpush.msrb.mxu3 %v1050_v2  ;;  %v1474_v13 = vsel %vm1464_vm12, %v3388_v7, %v3389_v6 }
 0x155   : > { %3526 = vrot.lane.b32.xlu0 %v3958_v54, %s3705_s18  ;;  %v3013_v54 = vld [vmem:[%s4871_s1 + $0x48] sm:$0xff]  ;;  %v1188_v1 = vsel %vm1179_vm11, %v3343_v56, %v3344_v57  ;;  %v3026_v57 = vld [vmem:[%s4871_s1 + $0x70] sm:$0xff] }
 0x156   : > { %v3332_v41 = vpop.permute.xlu0 %3331 }
 0x157   : > { %v3334_v53 = vunpack.i.h.bf16 %v3332_v41  ;;  %v3333_v42 = vunpack.i.l.bf16 %v3332_v41  ;;  %3007 = vmatmul.msk.f32.gmra.mxu3 %vm630_vm7, %v4181_v50 }
 0x158   : > { %v4252_v26 = vpop.permute.xlu1 %3366  ;;  %v4258_v48 = vpop.permute.xlu2 %3401 }
 0x159   : > { %v1051_v44 = vsel %vm1047_vm10, %v3333_v42, %v3318_v12  ;;  %v1048_v46 = vsel %vm1047_vm10, %v3334_v53, %v3323_v37  ;;  %v3369_v18 = vunpack.i.h.bf16 %v4252_v26  ;;  %v3404_v53 = vunpack.i.h.bf16 %v4258_v48 }
 0x15a   : > { %1092 = vmatpush.msra.mxu1 %v1051_v44  ;;  %v3403_v42 = vunpack.i.l.bf16 %v4258_v48 }
 0x15b   : > { %3017 = vmatmul.msk.f32.gmra.mxu2 %vm630_vm7, %v3013_v54  ;;  %3009 = vmatmul.msk.f32.gmra.mxu0 %vm630_vm7, %v4181_v50 }
 0x15c   : > { %1093 = vmatpush.msra.mxu1 %v1048_v46 }
 0x15d   : > { %3014 = vmatmul.msk.f32.vlgmr.msra.gmra.mxu1 %vm630_vm7, %v3012_v36 }
 0x15e   : > { %v3337_v27 = vpop.permute.xlu0 %3336 }
 0x15f   : > { %v3339_v58 = vunpack.i.h.bf16 %v3337_v27  ;;  %v3338_v59 = vunpack.i.l.bf16 %v3337_v27  ;;  %3018 = vmatmul.msk.f32.vlgmr.msrb.gmra.mxu3 %vm630_vm7, %v3012_v36 }
 0x160   : > { %v4270_v61 = vpop.permute.xlu1 %3381  ;;  %v4279_v5 = vpop.permute.xlu2 %3416 }
 0x161   : > { %v1190_v49 = vsel %vm1179_vm11, %v3358_v19, %v3338_v59  ;;  %v1191_v40 = vsel %vm1179_vm11, %v3338_v59, %v3339_v58  ;;  %v3368_v19 = vunpack.i.l.bf16 %v4252_v26  ;;  %v3384_v35 = vunpack.i.h.bf16 %v4270_v61 }
 0x162   : > { %1245 = vmatpush.msrb.mxu1 %v1190_v49  ;;  %1268 = vmatpush.msrb.mxu2 %v1191_v40  ;;  %v3383_v34 = vunpack.i.l.bf16 %v4270_v61  ;;  %v3419_v58 = vunpack.i.h.bf16 %v4279_v5  ;;  %v3418_v59 = vunpack.i.l.bf16 %v4279_v5 }
 0x163   : > { %v1183_v51 = vsel %vm1179_vm11, %v3369_v18, %v3368_v19 }
 0x164   : > { %1269 = vmatpush.msrb.mxu2 %v1188_v1  ;;  %v1321_v2 = vsel %vm1314_vm13, %v3383_v34, %v3384_v35 }
 0x165   : > { %3015 = vmatmul.msk.f32.gmra.mxu1 %vm630_vm7, %v3013_v54 }
 0x166   : > { %v3347_v55 = vpop.permute.xlu0 %3346 }
 0x167   : > { %v3349_v12 = vunpack.i.h.bf16 %v3347_v55  ;;  %v3348_v4 = vunpack.i.l.bf16 %v3347_v55  ;;  %3019 = vmatmul.msk.f32.gmra.mxu3 %vm630_vm7, %v3013_v54 }
 0x168   : > { %v4285_v8 = vpop.permute.xlu1 %3396  ;;  %v4303_v23 = vpop.permute.xlu2 %3431 }
 0x169   : > { %v1185_v50 = vsel %vm1179_vm11, %v3348_v4, %v3349_v12  ;;  %v3399_v10 = vunpack.i.h.bf16 %v4285_v8  ;;  %v3398_v43 = vunpack.i.l.bf16 %v4285_v8  ;;  %v1184_v24 = vsel %vm1179_vm11, %v3368_v19, %v3348_v4  ;;  %v4361_v4 = vld [vmem:[%s4871_s1 + $0x50] sm:$0xff] }
 0x16a   : > { %1270 = vmatpush.msrb.mxu2 %v1185_v50  ;;  %v1465_v12 = vsel %vm1464_vm12, %v3418_v59, %v3419_v58  ;;  %v3433_v18 = vunpack.i.l.bf16 %v4303_v23  ;;  %v4433_v59 = vld [vmem:[%s4871_s1 + $0x20] sm:$0xff] }
 0x16b   : > { %v1471_v11 = vsel %vm1464_vm12, %v3398_v43, %v3399_v10 }
 0x16c   : > { %1271 = vmatpush.msrb.mxu2 %v1182_v9 }
 0x16d   : > { %3024 = vmatmul.msk.f32.vlgmr.msrb.gmra.mxu2 %vm630_vm7, %v3010_v15 }
 0x16e   : > { %1507 = vmatpush.msra.mxu2 %v1474_v13  ;;  %v3362_v14 = vpop.permute.xlu0 %3361  ;;  %v3434_v13 = vunpack.i.h.bf16 %v4303_v23  ;;  %v4384_v23 = vld [vmem:[%s4871_s1 + $0x58] sm:$0xff] }
 0x16f   : > { %v3364_v21 = vunpack.i.h.bf16 %v3362_v14  ;;  %v3363_v22 = vunpack.i.l.bf16 %v3362_v14 }
 0x170   : > { %1508 = vmatpush.msra.mxu2 %v1471_v11  ;;  %v3412_v28 = vpop.permute.xlu1 %3411 }
 0x171   : > { %v1186_v32 = vsel %vm1179_vm11, %v3364_v21, %v3363_v22  ;;  %v1187_v29 = vsel %vm1179_vm11, %v3363_v22, %v3343_v56  ;;  %v3414_v17 = vunpack.i.h.bf16 %v3412_v28  ;;  %v3413_v60 = vunpack.i.l.bf16 %v3412_v28  ;;  %v4324_v47 = vpop.permute.xlu2 %3446 }
 0x172   : > { %1223 = vmatpush.msrb.mxu0 %v1186_v32  ;;  %1246 = vmatpush.msrb.mxu1 %v1187_v29  ;;  %v1315_v56 = vsel %vm1314_vm13, %v3403_v42, %v3404_v53  ;;  %v1317_v28 = vsel %vm1314_vm13, %v3433_v18, %v3434_v13  ;;  %v1316_v29 = vsel %vm1314_vm13, %v3404_v53, %v3433_v18  ;;  %v3449_v34 = vunpack.i.h.bf16 %v4324_v47 }
 0x173   : > { %v1326_v31 = vsel %vm1314_vm13, %v3413_v60, %v3414_v17 }
 0x174   : > { %1224 = vmatpush.msrb.mxu0 %v1183_v51  ;;  %1247 = vmatpush.msrb.mxu1 %v1184_v24  ;;  %v1466_v8 = vsel %vm1464_vm12, %v3419_v58, %v3449_v34 }
 0x175   : > { %3025 = vmatmul.msk.f32.gmra.mxu2 %vm630_vm7, %v3011_v16 }
 0x176   : > { %v3377_v33 = vpop.permute.xlu0 %3376  ;;  %1225 = vmatpush.msrb.mxu0 %v1180_v30  ;;  %1248 = vmatpush.msrb.mxu1 %v1181_v20  ;;  %v3448_v20 = vunpack.i.l.bf16 %v4324_v47 }
 0x177   : > { %v3379_v52 = vunpack.i.h.bf16 %v3377_v33  ;;  %v3378_v37 = vunpack.i.l.bf16 %v3377_v33  ;;  %3020 = vmatmul.msk.f32.vlgmr.msrb.gmra.mxu0 %vm630_vm7, %v3010_v15  ;;  %3022 = vmatmul.msk.f32.vlgmr.msrb.gmra.mxu1 %vm630_vm7, %v3010_v15 }
 0x178   : > { %1403 = vmatpush.msra.mxu1 %v1326_v31  ;;  %v3427_v36 = vpop.permute.xlu1 %3426 }
 0x179   : > { %v1324_v38 = vsel %vm1314_vm13, %v3378_v37, %v3379_v52  ;;  %v1325_v63 = vsel %vm1314_vm13, %v3379_v52, %v3413_v60  ;;  %v4338_v27 = vpop.permute.xlu2 %3461  ;;  %v3429_v50 = vunpack.i.h.bf16 %v3427_v36  ;;  %v3428_v15 = vunpack.i.l.bf16 %v3427_v36 }
 0x17a   : > { %1357 = vmatpush.msra.mxu3 %v1324_v38  ;;  %1380 = vmatpush.msra.mxu0 %v1325_v63  ;;  %v3463_v5 = vunpack.i.l.bf16 %v4338_v27 }
 0x17b   : > { %v1320_v45 = vsel %vm1314_vm13, %v3428_v15, %v3429_v50 }
 0x17c   : > { %1358 = vmatpush.msra.mxu3 %v1321_v2 }
 0x17e   : > { %v3392_v41 = vpop.permute.xlu0 %3391 }
 0x17f   : > { %v3394_v26 = vunpack.i.h.bf16 %v3392_v41  ;;  %v3393_v44 = vunpack.i.l.bf16 %v3392_v41  ;;  %3021 = vmatmul.msk.f32.gmra.mxu0 %vm630_vm7, %v3011_v16  ;;  %3023 = vmatmul.msk.f32.gmra.mxu1 %vm630_vm7, %v3011_v16  ;;  %v3464_v41 = vunpack.i.h.bf16 %v4338_v27 }
 0x180   : > { %v4331_v46 = vpop.permute.xlu1 %3441 }
 0x181   : > { %v1318_v54 = vsel %vm1314_vm13, %v3393_v44, %v3394_v26  ;;  %v3444_v40 = vunpack.i.h.bf16 %v4331_v46  ;;  %v3443_v1 = vunpack.i.l.bf16 %v4331_v46  ;;  %v4369_v9 = vpop.permute.xlu2 %3476  ;;  %v1319_v25 = vsel %vm1314_vm13, %v3394_v26, %v3428_v15  ;;  %v4458_v46 = vld [vmem:[%s4871_s1 + $0x28] sm:$0xff] }
 0x182   : > { %1359 = vmatpush.msra.mxu3 %v1318_v54  ;;  %v3478_v13 = vunpack.i.l.bf16 %v4369_v9  ;;  %v3479_v18 = vunpack.i.h.bf16 %v4369_v9 }
 0x183   : > { %v1607_v7 = vsel %vm1596_vm14, %v3443_v1, %v3444_v40 }
 0x184   : > { %1360 = vmatpush.msra.mxu3 %v1315_v56 }
 0x185   : > { %3028 = vmatmul.msk.f32.vlgmr.msra.gmra.mxu3 %vm630_vm7, %v3026_v57 }
 0x186   : > { %v4341_v48 = vpop.permute.xlu0 %3406 }
 0x187   : > { %v3409_v61 = vunpack.i.h.bf16 %v4341_v48  ;;  %v3408_v49 = vunpack.i.l.bf16 %v4341_v48 }
 0x188   : > { %v4349_v3 = vpop.permute.xlu1 %3456 }
 0x189   : > { %v1468_v55 = vsel %vm1464_vm12, %v3408_v49, %v3409_v61  ;;  %v4388_v30 = vpop.permute.xlu2 %3491  ;;  %v1469_v39 = vsel %vm1464_vm12, %v3409_v61, %v3448_v20  ;;  %v3458_v38 = vunpack.i.l.bf16 %v4349_v3  ;;  %v1598_v61 = vsel %vm1596_vm14, %v3463_v5, %v3464_v41 }
 0x18a   : > { %1509 = vmatpush.msra.mxu2 %v1468_v55  ;;  %v3494_v42 = vunpack.i.h.bf16 %v4388_v30  ;;  %v3493_v56 = vunpack.i.l.bf16 %v4388_v30 }
 0x18c   : > { %1510 = vmatpush.msra.mxu2 %v1465_v12  ;;  %v1743_v49 = vsel %vm1731_vm15, %v3493_v56, %v3494_v42 }
 0x18d   : > { %3029 = vmatmul.msk.f32.gmra.mxu3 %vm630_vm7, %v3027_v62  ;;  %3038 = vmatmul.msk.f32.vlgmr.msra.gmra.mxu2 %vm630_vm7, %v4361_v4 }
 0x18e   : > { %1662 = vmatpush.msrb.mxu2 %v1607_v7  ;;  %v3422_v43 = vpop.permute.xlu0 %3421 }
 0x18f   : > { %v3424_v14 = vunpack.i.h.bf16 %v3422_v43  ;;  %v3423_v11 = vunpack.i.l.bf16 %v3422_v43 }
 0x190   : > { %v3472_v19 = vpop.permute.xlu1 %3471 }
 0x191   : > { %v1322_v21 = vsel %vm1314_vm13, %v3384_v35, %v3423_v11  ;;  %v1323_v22 = vsel %vm1314_vm13, %v3423_v11, %v3424_v14  ;;  %v3473_v32 = vunpack.i.l.bf16 %v3472_v19  ;;  %v3474_v60 = vunpack.i.h.bf16 %v3472_v19 }
 0x192   : > { %1381 = vmatpush.msra.mxu0 %v1322_v21  ;;  %1404 = vmatpush.msra.mxu1 %v1323_v22 }
 0x194   : > { %1382 = vmatpush.msra.mxu0 %v1319_v25  ;;  %1405 = vmatpush.msra.mxu1 %v1320_v45 }
 0x195   : > { %3039 = vmatmul.msk.f32.gmra.mxu2 %vm630_vm7, %v4384_v23 }
 0x196   : > { %1383 = vmatpush.msra.mxu0 %v1316_v29  ;;  %1406 = vmatpush.msra.mxu1 %v1317_v28  ;;  %v1597_v29 = vsel %vm1596_vm14, %v3479_v18, %v3463_v5 }
 0x197   : > { %v3437_v17 = vpop.permute.xlu0 %3436  ;;  %3030 = vmatmul.msk.f32.vlgmr.msra.gmra.mxu0 %vm630_vm7, %v3026_v57  ;;  %3032 = vmatmul.msk.f32.vlgmr.msra.gmra.mxu1 %vm630_vm7, %v3026_v57  ;;  %v4422_v57 = vpop.permute.xlu2 %3506 }
 0x198   : > { %v3439_v51 = vunpack.i.h.bf16 %v3437_v17  ;;  %v3438_v24 = vunpack.i.l.bf16 %v3437_v17  ;;  %v3508_v55 = vunpack.i.l.bf16 %v4422_v57 }
 0x199   : > { %v3487_v31 = vpop.permute.xlu1 %3486 }
 0x19a   : > { %v1475_v33 = vsel %vm1464_vm12, %v3389_v6, %v3438_v24  ;;  %v1476_v35 = vsel %vm1464_vm12, %v3438_v24, %v3473_v32  ;;  %v1472_v52 = vsel %vm1464_vm12, %v3399_v10, %v3439_v51  ;;  %v1473_v37 = vsel %vm1464_vm12, %v3439_v51, %v3474_v60 }
 0x19b   : > { %1530 = vmatpush.msrb.mxu3 %v1475_v33  ;;  %1553 = vmatpush.msrb.mxu0 %v1476_v35  ;;  %v3488_v16 = vunpack.i.l.bf16 %v3487_v31  ;;  %v3489_v36 = vunpack.i.h.bf16 %v3487_v31  ;;  %v3459_v10 = vunpack.i.h.bf16 %v4349_v3 }
 0x19d   : > { %1531 = vmatpush.msrb.mxu3 %v1472_v52  ;;  %1554 = vmatpush.msrb.mxu0 %v1473_v37  ;;  %v1608_v53 = vsel %vm1596_vm14, %v3444_v40, %v3488_v16  ;;  %v1601_v48 = vsel %vm1596_vm14, %v3458_v38, %v3459_v10  ;;  %v3509_v40 = vunpack.i.h.bf16 %v4422_v57 }
 0x19f   : > { %v3452_v6 = vpop.permute.xlu0 %3451  ;;  %1532 = vmatpush.msrb.mxu3 %v1469_v39  ;;  %3031 = vmatmul.msk.f32.gmra.mxu0 %vm630_vm7, %v3027_v62  ;;  %v1737_v11 = vsel %vm1731_vm15, %v3508_v55, %v3509_v40  ;;  %v3522_v21 = vpop.permute.xlu2 %3521  ;;  %v3706_v39 = vmov 0  }
 0x1a0   : > { %v3454_v63 = vunpack.i.h.bf16 %v3452_v6  ;;  %v3453_v2 = vunpack.i.l.bf16 %v3452_v6  ;;  %3033 = vmatmul.msk.f32.gmra.mxu1 %vm630_vm7, %v3027_v62  ;;  %v3523_v17 = vunpack.i.l.bf16 %v3522_v21  ;;  %v3524_v30 = vunpack.i.h.bf16 %v3522_v21  ;;  %3536 = vset.pattern.permute.xlu0 %v3706_v39 }
 0x1a1   : > { %1533 = vmatpush.msrb.mxu3 %v1466_v8  ;;  %v3502_v26 = vpop.permute.xlu1 %3501  ;;  %3535 = vset.pattern.permute.xlu2 %v3706_v39 }
 0x1a2   : > { %v1604_v44 = vsel %vm1596_vm14, %v3453_v2, %v3454_v63  ;;  %v1605_v54 = vsel %vm1596_vm14, %v3454_v63, %v3489_v36  ;;  %3040 = vmatmul.msk.f32.vlgmr.msrb.gmra.mxu3 %vm630_vm7, %v4361_v4  ;;  %v3504_v58 = vunpack.i.h.bf16 %v3502_v26  ;;  %v3503_v62 = vunpack.i.l.bf16 %v3502_v26  ;;  %3642 = vset.pattern.permute.xlu1 %v3706_v39 }
 0x1a3   : > { %1685 = vmatpush.msra.mxu3 %v1608_v53  ;;  %1663 = vmatpush.msrb.mxu2 %v1604_v44  ;;  %v654_v52 = vpop.f32.mrf.mxu0  ;;  %v1738_v36 = vsel %vm1731_vm15, %v3524_v30, %v3523_v17 }
 0x1a4   : > { %v1740_v43 = vsel %vm1731_vm15, %v3503_v62, %v3504_v58  ;;  %v1739_v31 = vsel %vm1731_vm15, %v3523_v17, %v3503_v62 }
 0x1a5   : > { %1686 = vmatpush.msra.mxu3 %v1605_v54  ;;  %1664 = vmatpush.msrb.mxu2 %v1601_v48  ;;  %v677_v25 = vpop.f32.mrf.mxu1 }
 0x1a6   : > { %v657_v45 = vpop.f32.mrf.mxu3 }
 0x1a7   : > { %v3467_v12 = vpop.permute.xlu0 %3466  ;;  %1665 = vmatpush.msrb.mxu2 %v1598_v61 }
 0x1a8   : > { %v3469_v7 = vunpack.i.h.bf16 %v3467_v12  ;;  %v3468_v50 = vunpack.i.l.bf16 %v3467_v12  ;;  %3046 = vmatmul.msk.f32.vlgmr.msrb.gmra.mxu2 %vm630_vm7, %v4433_v59  ;;  %v3051_v12 = vld [vmem:[%s4871_s1 + $0x88] sm:$0xff] }
 0x1a9   : > { %1820 = vmatpush.msra.mxu2 %v1743_v49  ;;  %v3517_v15 = vpop.permute.xlu1 %3516 }
 0x1aa   : > { %v1606_v14 = vsel %vm1596_vm14, %v3468_v50, %v3443_v1  ;;  %3041 = vmatmul.msk.f32.gmra.mxu3 %vm630_vm7, %v4384_v23  ;;  %v1603_v19 = vsel %vm1596_vm14, %v3469_v7, %v3453_v2  ;;  %v3518_v22 = vunpack.i.l.bf16 %v3517_v15  ;;  %v1600_v1 = vsel %vm1596_vm14, %v3478_v13, %v3458_v38  ;;  %v700_v38 = vpop.f32.mrf.mxu2 }
 0x1ab   : > { %1639 = vmatpush.msrb.mxu1 %v1606_v14  ;;  %1821 = vmatpush.msra.mxu2 %v1740_v43  ;;  %v3519_v60 = vunpack.i.h.bf16 %v3517_v15 }
 0x1ac   : > { %v1742_v51 = vsel %vm1731_vm15, %v3518_v22, %v3493_v56 }
 0x1ad   : > { %1640 = vmatpush.msrb.mxu1 %v1603_v19  ;;  %1822 = vmatpush.msra.mxu2 %v1737_v11  ;;  %v1741_v35 = vsel %vm1731_vm15, %v3519_v60, %v3518_v22  ;;  %v680_v37 = vpop.f32.mrf.mxu1  ;;  %v496_v60 = vlaneseq }
 0x1af   : > { %v3482_v28 = vpop.permute.xlu0 %3481  ;;  %1641 = vmatpush.msrb.mxu1 %v1600_v1 }
 0x1b0   : > { %v3484_v32 = vunpack.i.h.bf16 %v3482_v28  ;;  %v3483_v9 = vunpack.i.l.bf16 %v3482_v28  ;;  %3047 = vmatmul.msk.f32.gmra.mxu2 %vm630_vm7, %v4458_v46 }
 0x1b1   : > { %1642 = vmatpush.msrb.mxu1 %v1597_v29  ;;  %v3532_v48 = vpop.permute.xlu1 %3531 }
 0x1b2   : > { %v1470_v24 = vsel %vm1464_vm12, %v3448_v20, %v3483_v9  ;;  %3044 = vmatmul.msk.f32.vlgmr.msrb.gmra.mxu1 %vm630_vm7, %v4433_v59  ;;  %v1467_v33 = vsel %vm1464_vm12, %v3449_v34, %v3484_v32  ;;  %v1867_v20 = vld [vmem:[%s4872_s2] sm:$0xff]  ;;  %v703_v5 = vpop.f32.mrf.mxu2  ;;  %v3533_v61 = vunpack.i.l.bf16 %v3532_v48 }
 0x1b3   : > { %1797 = vmatpush.msra.mxu1 %v1742_v51  ;;  %1555 = vmatpush.msrb.mxu0 %v1470_v24  ;;  %v497_v51 = vand.u32 127, %v496_v60 }
 0x1b4   : > { %1871 = vperm.xlu0 %3536, %v1867_v20  }
 0x1b5   : > { %1798 = vmatpush.msra.mxu1 %v1739_v31  ;;  %1556 = vmatpush.msrb.mxu0 %v1467_v33  ;;  %v4526_v30 = vand.u32 15, %v497_v51  ;;  %v498_v20 = vadd.s32 128, %v497_v51 }
 0x1b6   : > { %3042 = vmatmul.msk.f32.vlgmr.msrb.gmra.mxu0 %vm630_vm7, %v4361_v4  ;;  %v786_v47 = vpop.f32.mrf.mxu3 }
 0x1b7   : > { %1774 = vmatpush.msra.mxu0 %v1741_v35  ;;  %v3497_v16 = vpop.permute.xlu0 %3496  ;;  %v787_v8 = vadd.f32 %v786_v47, %v654_v52  ;;  %v4529_v33 = vadd.s32 4294967294, %v4526_v30  ;;  %v4536_v39 = vand.u32 15, %v498_v20 }
 0x1b8   : > { %v3499_v34 = vunpack.i.h.bf16 %v3497_v16  ;;  %v3498_v6 = vunpack.i.l.bf16 %v3497_v16 }
 0x1b9   : > { %1775 = vmatpush.msra.mxu0 %v1738_v36  ;;  %vm982_vm0 = vcmp.ge.s32.totalorder %v4529_v33, 0 }
 0x1ba   : > { %v1602_v63 = vsel %vm1596_vm14, %v3459_v10, %v3498_v6  ;;  %3045 = vmatmul.msk.f32.gmra.mxu1 %vm630_vm7, %v4458_v46  ;;  %v1599_v4 = vsel %vm1596_vm14, %v3464_v41, %v3499_v34  ;;  %v3050_v10 = vld [vmem:[%s4871_s1 + $0x80] sm:$0xff] }
 0x1bb   : > { %1687 = vmatpush.msra.mxu3 %v1602_v63 }
 0x1bd   : > { %1688 = vmatpush.msra.mxu3 %v1599_v4 }
 0x1be   : > { %3048 = vmatmul.msk.f32.vlgmr.msra.gmra.mxu3 %vm630_vm7, %v4433_v59  ;;  %3043 = vmatmul.msk.f32.gmra.mxu0 %vm630_vm7, %v4384_v23  ;;  %v789_v26 = vpop.f32.mrf.mxu3  ;;  %v1868_v23 = vld [vmem:[%s4872_s2 + $0x8] sm:$0xff]  ;;  %v3534_v59 = vunpack.i.h.bf16 %v3532_v48  ;;  %v921_v62 = vpop.f32.mrf.mxu2 }
 0x1bf   : > { %v3512_v2 = vpop.permute.xlu0 %3511  ;;  %v790_v54 = vadd.f32 %v789_v26, %v657_v45  ;;  %1876 = vperm.xlu2 %3535, %v1868_v23   ;;  %v973_v50 = vadd.f32 %v921_v62, %v787_v8  ;;  %v980_v8 = vadd.s32 4294967294, %v4536_v39 }
 0x1c0   : > { %v3514_v53 = vunpack.i.h.bf16 %v3512_v2  ;;  %v3513_v3 = vunpack.i.l.bf16 %v3512_v2  ;;  %v832_v42 = vpop.f32.mrf.mxu1  ;;  %v809_v41 = vpop.f32.mrf.mxu0  ;;  %v1732_v14 = vsel %vm1731_vm15, %v3534_v59, %v3533_v61 }
 0x1c1   : > { %v4497_v44 = vadd.f32 %v832_v42, %v700_v38  ;;  %v810_v56 = vadd.f32 %v809_v41, %v677_v25  ;;  %v997_v16 = vsel %vm982_vm0, %v973_v50, 0.0  ;;  %vm983_vm1 = vcmp.ge.s32.totalorder %v980_v8, 0 }
 0x1c2   : > { %v1734_v27 = vsel %vm1731_vm15, %v3513_v3, %v3514_v53  ;;  %v1733_v11 = vsel %vm1731_vm15, %v3533_v61, %v3513_v3 }
 0x1c3   : > { %1823 = vmatpush.msra.mxu2 %v1734_v27 }
 0x1c4   : > { %3056 = vmatmul.msk.f32.vlgmr.msra.gmra.mxu2 %vm630_vm7, %v3050_v10 }
 0x1c6   : > { %3049 = vmatmul.msk.f32.gmra.mxu3 %vm630_vm7, %v4458_v46 }
 0x1c7   : > { %v3527_v58 = vpop.permute.xlu0 %3526 }
 0x1c8   : > { %v3529_v49 = vunpack.i.h.bf16 %v3527_v58  ;;  %v3528_v40 = vunpack.i.l.bf16 %v3527_v58  ;;  %v835_v7 = vpop.f32.mrf.mxu1  ;;  %v812_v18 = vpop.f32.mrf.mxu0 }
 0x1c9   : > { %v4512_v15 = vadd.f32 %v835_v7, %v703_v5  ;;  %v813_v57 = vadd.f32 %v812_v18, %v680_v37  ;;  %v924_v19 = vpop.f32.mrf.mxu2 }
 0x1ca   : > { %v1735_v43 = vsel %vm1731_vm15, %v3529_v49, %v3528_v40  ;;  %v1736_v13 = vsel %vm1731_vm15, %v3528_v40, %v3508_v55  ;;  %v4519_v55 = vadd.f32 %v924_v19, %v790_v54 }
 0x1cb   : > { %1776 = vmatpush.msra.mxu0 %v1735_v43  ;;  %1799 = vmatpush.msra.mxu1 %v1736_v13 }
 0x1cc   : > { %3057 = vmatmul.msk.f32.gmra.mxu2 %vm630_vm7, %v3051_v12 }
 0x1cd   : > { %1777 = vmatpush.msra.mxu0 %v1732_v14  ;;  %1800 = vmatpush.msra.mxu1 %v1733_v11 }
 0x1ce   : > { %3052 = vmatmul.msk.f32.vlgmr.msra.gmra.mxu0 %vm630_vm7, %v3050_v10  ;;  %3054 = vmatmul.msk.f32.vlgmr.msra.gmra.mxu1 %vm630_vm7, %v3050_v10 }
 0x1d0   : > { %v967_v45 = vpop.f32.mrf.mxu0 }
 0x1d1   : > { %v975_v19 = vadd.f32 %v967_v45, %v4497_v44  ;;  %v1838_v45 = vadd.s32 2, %v4536_v39 }
 0x1d2   : > { %v944_v21 = vpop.f32.mrf.mxu3 }
 0x1d3   : > { %v974_v22 = vadd.f32 %v944_v21, %v810_v56  ;;  %vm1844_vm6 = vcmp.lt.s32.totalorder %v1838_v45, 16 }
 0x1d5   : > { %v998_v2 = vsel %vm983_vm1, %v974_v22, 0.0 }
 0x1d6   : > { %3053 = vmatmul.msk.f32.gmra.mxu0 %vm630_vm7, %v3051_v12  ;;  %3055 = vmatmul.msk.f32.gmra.mxu1 %vm630_vm7, %v3051_v12  ;;  %v1118_v17 = vpop.f32.mrf.mxu2  ;;  %v499_v12 = vadd.s32 256, %v497_v51 }
 0x1d8   : > { %v4523_v25 = vpop.f32.mrf.mxu0  ;;  %v518_v7 = vand.u32 15, %v499_v12 }
 0x1da   : > { %v947_v46 = vpop.f32.mrf.mxu3  ;;  %v1095_v28 = vpop.f32.mrf.mxu1  ;;  %v981_v13 = vadd.s32 4294967294, %v518_v7 }
 0x1db   : > { %v977_v1 = vadd.f32 %v947_v46, %v813_v57  ;;  %v1839_v57 = vadd.s32 2, %v518_v7 }
 0x1dc   : > { %vm984_vm3 = vcmp.ge.s32.totalorder %v981_v13, 0 }
 0x1dd   : > { %v1001_v26 = vsel %vm983_vm1, %v977_v1, 0.0  ;;  %vm1845_vm4 = vcmp.lt.s32.totalorder %v1839_v57, 16  ;;  %v999_v1 = vsel %vm984_vm3, %v975_v19, 0.0  ;;  %vm1940_vm1 = vcmask 1047584  }
 0x1de   : > { %v1121_v31 = vpop.f32.mrf.mxu2 }
 0x1e2   : > { %v1141_v32 = vpop.f32.mrf.mxu3  ;;  %v4531_v35 = vpop.f32.mrf.mxu1 }
 0x1ea   : > { %v1144_v24 = vpop.f32.mrf.mxu3 }
 0x1f0   : > { %v1273_v34 = vpop.f32.mrf.mxu2 }
 0x1f1   : > { %v1274_v14 = vadd.f32 %v1273_v34, %v1141_v32 }
 0x1f4   : > { %v1227_v9 = vpop.f32.mrf.mxu0  ;;  %v1250_v6 = vpop.f32.mrf.mxu1 }
 0x1f5   : > { %v1228_v29 = vadd.f32 %v1227_v9, %v1095_v28  ;;  %v1251_v38 = vadd.f32 %v1250_v6, %v1118_v17 }
 0x1f8   : > { %v1276_v53 = vpop.f32.mrf.mxu2 }
 0x1fc   : > { %v1230_v36 = vpop.f32.mrf.mxu0  ;;  %v1253_v5 = vpop.f32.mrf.mxu1 }
 0x1fd   : > { %v1254_v10 = vadd.f32 %v1253_v5, %v1121_v31  ;;  %v1231_v34 = vadd.f32 %v1230_v36, %v4531_v35 }
 0x208   : > { %v1362_v52 = vpop.f32.mrf.mxu3 }
 0x209   : > { %v1414_v37 = vadd.f32 %v1362_v52, %v1228_v29  ;;  %v1277_v29 = vadd.f32 %v1276_v53, %v1144_v24  ;;  %v1837_v53 = vadd.s32 2, %v4526_v30 }
 0x20b   : > { %v4538_v47 = vadd.f32 %v1414_v37, %v997_v16  ;;  %v978_v37 = vadd.f32 %v4523_v25, %v4512_v15  ;;  %v4557_v16 = vstv %s1885_s12  ;;  %vm1843_vm8 = vcmp.lt.s32.totalorder %v1837_v53, 16  ;;  %v1961_v53 = vld [vmem:[%s4873_s3] sm:$0xff] }
 0x210   : > { %v4543_v41 = vpop.f32.mrf.mxu2  ;;  %v1365_v23 = vpop.f32.mrf.mxu3 }
 0x211   : > { %v1417_v35 = vadd.f32 %v1365_v23, %v1231_v34  ;;  %v1000_v23 = vsel %vm982_vm0, %v4519_v55, 0.0  ;;  %vm1956_vm0 = vcmask 1048096  }
 0x214   : > { %v1385_v63 = vpop.f32.mrf.mxu0  ;;  %v1408_v56 = vpop.f32.mrf.mxu1 }
 0x215   : > { %v1415_v4 = vadd.f32 %v1385_v63, %v1251_v38  ;;  %v1416_v21 = vadd.f32 %v1408_v56, %v1274_v14 }
 0x217   : > { %v4541_v3 = vadd.f32 %v1415_v4, %v998_v2  ;;  %v1422_v9 = vadd.f32 %v1416_v21, %v999_v1  ;;  %v1002_v2 = vsel %vm984_vm3, %v978_v37, 0.0  ;;  %vm1953_vm3 = vcmask 556064  }
 0x218   : > { %v1515_v48 = vpop.f32.mrf.mxu2 }
 0x21c   : > { %v1388_v42 = vpop.f32.mrf.mxu0 }
 0x21d   : > { %v1418_v27 = vadd.f32 %v1388_v42, %v1254_v10  ;;  %v1411_v59 = vpop.f32.mrf.mxu1 }
 0x21e   : > { %v1419_v6 = vadd.f32 %v1411_v59, %v1277_v29 }
 0x21f   : > { %v4545_v54 = vadd.f32 %v1418_v27, %v1001_v26  ;;  %v1877_v26 = vpop.permute.xlu2 %1876 }
 0x220   : > { %v1425_v36 = vadd.f32 %v1419_v6, %v1002_v2 }
 0x225   : > { %v1535_v58 = vpop.f32.mrf.mxu3 }
 0x226   : > { %v4552_v31 = vpop.permute.xlu0 %1871 }
 0x22b   : > { %v1667_v61 = vpop.f32.mrf.mxu2 }
 0x22c   : > { %v1668_v17 = vadd.f32 %v1667_v61, %v1535_v58 }
 0x22d   : > { %v1538_v40 = vpop.f32.mrf.mxu3 }
 0x22f   : > { %v4547_v49 = vpop.f32.mrf.mxu1 }
 0x230   : > { %v1645_v14 = vadd.f32 %v4547_v49, %v4543_v41 }
 0x233   : > { %v1558_v62 = vpop.f32.mrf.mxu0  ;;  %v1670_v50 = vpop.f32.mrf.mxu2 }
 0x234   : > { %v1671_v15 = vadd.f32 %v1670_v50, %v1538_v40 }
 0x237   : > { %v1647_v43 = vpop.f32.mrf.mxu1 }
 0x238   : > { %v1648_v10 = vadd.f32 %v1647_v43, %v1515_v48 }
 0x23b   : > { %v1561_v18 = vpop.f32.mrf.mxu0 }
 0x241   : > { %v1690_v11 = vpop.f32.mrf.mxu3 }
 0x242   : > { %v1691_v22 = vadd.f32 %v1690_v11, %v1558_v62  ;;  %v1423_v62 = vadd.f32 %v1417_v35, %v1000_v23  ;;  %v2679_v35 = vld [vmem:[%s4874_s4] sm:$0xff] }
 0x247   : > { %v1825_v46 = vpop.f32.mrf.mxu2 }
 0x248   : > { %v1833_v28 = vadd.f32 %v1825_v46, %v1691_v22 }
 0x249   : > { %v1693_v32 = vpop.f32.mrf.mxu3 }
 0x24a   : > { %v1857_v51 = vsel %vm1845_vm4, %v1833_v28, 0.0  ;;  %v1694_v8 = vadd.f32 %v1693_v32, %v1561_v18 }
 0x24b   : > { %v1863_v20 = vadd.f32 %v1857_v51, %v1422_v9  ;;  %v1779_v52 = vpop.f32.mrf.mxu0  ;;  %v1802_v44 = vpop.f32.mrf.mxu1 }
 0x24c   : > { %v1832_v38 = vadd.f32 %v1802_v44, %v1668_v17  ;;  %v1831_v57 = vadd.f32 %v1779_v52, %v1645_v14 }
 0x24d   : > { %v1881_v24 = vadd.f32 %v4552_v31, %v1863_v20 }
 0x24e   : > { %v1856_v42 = vsel %vm1844_vm6, %v1832_v38, 0.0  ;;  %v1855_v46 = vsel %vm1843_vm8, %v1831_v57, 0.0 }
 0x24f   : > { %v1828_v63 = vpop.f32.mrf.mxu2  ;;  %vm1888_vm7 = vcmp.ge.f32.partialorder %v1881_v24, 0.0  ;;  %v1895_v4 = vmul.f32 %v4557_v16, %v1881_v24  ;;  %v1862_v48 = vadd.f32 %v1856_v42, %v4541_v3  ;;  %v1861_v41 = vadd.f32 %v1855_v46, %v4538_v47 }
 0x250   : > { %v1836_v25 = vadd.f32 %v1828_v63, %v1694_v8 }
 0x251   : > { %v1901_v5 = vsel %vm1888_vm7, %v1881_v24, %v1895_v4  ;;  %v1880_v55 = vadd.f32 %v4552_v31, %v1862_v48  ;;  %v1879_v1 = vadd.f32 %v4552_v31, %v1861_v41 }
 0x252   : > { %v1860_v27 = vsel %vm1845_vm4, %v1836_v25, 0.0  ;;  %1920 = vrot.lane.b32.xlu0 %v1901_v5, %s3707_s14  ;;  %vm1990_vm4 = vcmask 523264  }
 0x253   : > { %v1866_v56 = vadd.f32 %v1860_v27, %v1425_v36  ;;  %v1782_v58 = vpop.f32.mrf.mxu0  ;;  %v1805_v59 = vpop.f32.mrf.mxu1  ;;  %v1894_v22 = vmul.f32 %v4557_v16, %v1880_v55  ;;  %vm1887_vm12 = vcmp.ge.f32.partialorder %v1880_v55, 0.0  ;;  %v1893_v9 = vmul.f32 %v4557_v16, %v1879_v1  ;;  %v2680_v36 = vld [vmem:[%s4874_s4 + $0x8] sm:$0xff] }
 0x254   : > { %v1834_v61 = vadd.f32 %v1782_v58, %v1648_v10  ;;  %v1835_v40 = vadd.f32 %v1805_v59, %v1671_v15  ;;  %vm1886_vm15 = vcmp.ge.f32.partialorder %v1879_v1, 0.0  ;;  %v1962_v27 = vld [vmem:[%s4873_s3 + $0x8] sm:$0xff] }
 0x255   : > { %v1884_v12 = vadd.f32 %v1877_v26, %v1866_v56  ;;  %v1899_v29 = vsel %vm1886_vm15, %v1879_v1, %v1893_v9 }
 0x256   : > { %v1858_v7 = vsel %vm1843_vm8, %v1834_v61, 0.0  ;;  %v1859_v50 = vsel %vm1844_vm6, %v1835_v40, 0.0 }
 0x257   : > { %v1864_v43 = vadd.f32 %v1858_v7, %v1423_v62  ;;  %vm1891_vm9 = vcmp.ge.f32.partialorder %v1884_v12, 0.0  ;;  %v1898_v13 = vmul.f32 %v4557_v16, %v1884_v12  ;;  %v1865_v33 = vadd.f32 %v1859_v50, %v4545_v54  ;;  %v3058_v7 = vld [vmem:[%s4873_s3 + $0x30] sm:$0xff] }
 0x258   : > { %v1900_v54 = vsel %vm1887_vm12, %v1880_v55, %v1894_v22  ;;  %v3076_v22 = vld [vmem:[%s4873_s3 + $0x40] sm:$0xff] }
 0x259   : > { %v1882_v11 = vadd.f32 %v1877_v26, %v1864_v43  ;;  %v1904_v18 = vsel %vm1891_vm9, %v1884_v12, %v1898_v13  ;;  %v1883_v19 = vadd.f32 %v1877_v26, %v1865_v33 }
 0x25a   : > { %1926 = vrot.lane.b32.xlu2 %v1904_v18, %s3707_s14 }
 0x25b   : > { %vm1889_vm10 = vcmp.ge.f32.partialorder %v1882_v11, 0.0  ;;  %v1896_v3 = vmul.f32 %v4557_v16, %v1882_v11  ;;  %v1897_v49 = vmul.f32 %v4557_v16, %v1883_v19  ;;  %vm1890_vm14 = vcmp.ge.f32.partialorder %v1883_v19, 0.0 }
 0x25d   : > { %v1902_v21 = vsel %vm1889_vm10, %v1882_v11, %v1896_v3  ;;  %v1903_v28 = vsel %vm1890_vm14, %v1883_v19, %v1897_v49  ;;  %v3059_v3 = vld [vmem:[%s4873_s3 + $0x38] sm:$0xff] }
 0x25e   : > { %1922 = vrot.lane.b32.xlu1 %v1902_v21, %s3707_s14 }
 0x262   : > { %1918 = vrot.lane.b32.xlu2 %v1900_v54, %s3707_s14 }
 0x266   : > { %1924 = vrot.lane.b32.xlu1 %v1903_v28, %s3707_s14 }
 0x26e   : > { %1916 = vrot.lane.b32.xlu1 %v1899_v29, %s3707_s14 }
 0x2b4   : > { %v1927_v17 = vpop.permute.xlu2 %1926 }
 0x2b5   : > { %1948 = vst.msk [vmem:[#allocation3 + $0x38] sm:$0xff] %vm410_vm2, %v1927_v17 }
 0x2b6   : > { %1960 = vst.msk [vmem:[#allocation3 + $0x38] sm:$0xff] %vm410_vm2, %v3695_v0 }
 0x2bc   : > { %v1919_v47 = vpop.permute.xlu2 %1918 }
 0x2bd   : > { %v2341_v4 = vld [vmem:[#allocation3 + $0x38] sm:$0xff] }
 0x2c4   : > { %v1921_v51 = vpop.permute.xlu0 %1920 }
 0x2c5   : > { %v1929_v32 = vsel %vm410_vm2, %v1919_v47, %v1921_v51  ;;  %1944 = vst.msk [vmem:[#allocation3 + $0x18] sm:$0xff] %vm410_vm2, %v1921_v51 }
 0x2c6   : > { %1943 = vst [vmem:[#allocation3 + $0x10] sm:$0xff] %v1929_v32  ;;  %v3068_v32 = vld [vmem:[%s4873_s3 + $0x60] sm:$0xff] }
 0x2c7   : > { %1957 = vst.msk [vmem:[#allocation3 + $0x10] sm:$0xff] %vm1956_vm0, %v3695_v0 }
 0x2c8   : > { %1958 = vst.msk [vmem:[#allocation3 + $0x18] sm:$0xff] %vm410_vm2, %v3695_v0 }
 0x2ce   : > { %v4611_v37 = vld [vmem:[#allocation3 + $0x10] sm:$0xff] }
 0x2d0   : > { %v1923_v31 = vpop.permute.xlu1 %1922 }
 0x2d1   : > { %1945 = vst.msk [vmem:[#allocation3 + $0x20] sm:$0xff] %vm1940_vm1, %v1923_v31 }
 0x2d2   : > { %1955 = vst.msk [vmem:[#allocation3 + $0x20] sm:$0xff] %vm1953_vm3, %v3695_v0 }
 0x2d8   : > { %v1925_v20 = vpop.permute.xlu1 %1924 }
 0x2d9   : > { %v4605_v52 = vsel %vm410_vm2, %v1923_v31, %v1925_v20  ;;  %v1931_v44 = vsel %vm410_vm2, %v1925_v20, %v1927_v17  ;;  %v1965_v45 = vld [vmem:[#allocation3 + $0x20] sm:$0xff]  ;;  %v3077_v31 = vld [vmem:[%s4873_s3 + $0x48] sm:$0xff] }
 0x2da   : > { %2095 = vmatpush.msrb.mxu2 %v4605_v52  ;;  %2072 = vmatpush.msrb.mxu1 %v1965_v45  ;;  %1947 = vst [vmem:[#allocation3 + $0x30] sm:$0xff] %v1931_v44 }
 0x2db   : > { %1959 = vst.msk [vmem:[#allocation3 + $0x30] sm:$0xff] %vm1956_vm0, %v3695_v0 }
 0x2e0   : > { %v1917_v16 = vpop.permute.xlu1 %1916 }
 0x2e1   : > { %v4614_v34 = vsel %vm410_vm2, %v1917_v16, %v1919_v47  ;;  %1941 = vst.msk [vmem:[#allocation3] sm:$0xff] %vm1940_vm1, %v1917_v16  ;;  %vm1999_vm2 = vcmask 130048  }
 0x2e2   : > { %2096 = vmatpush.msrb.mxu2 %v4614_v34  ;;  %v3542_v6 = vpack.i.bf16 %v4611_v37, %v4614_v34  ;;  %1954 = vst.msk [vmem:[#allocation3] sm:$0xff] %vm1953_vm3, %v3695_v0  ;;  %v4622_v24 = vld [vmem:[#allocation3 + $0x30] sm:$0xff]  ;;  %v2338_v0 = vld [vmem:[#allocation3 + $0x18] sm:$0xff]  ;;  %v3607_v25 = vpack.i.bf16 %v4614_v34, %v4605_v52 }
 0x2e3   : > { %v3537_v8 = vpack.i.bf16 %v4622_v24, %v4605_v52  ;;  %v3582_v2 = vpack.i.bf16 %v2338_v0, %v4611_v37  ;;  %v3587_v15 = vpack.i.bf16 %v2341_v4, %v4622_v24  ;;  %3066 = vmatmul.msk.f32.vlgmr.msrb.gmra.mxu2 %vm1999_vm2, %v1961_v53 }
 0x2e4   : > { %3543 = vrot.lane.b32.xlu0 %v3542_v6, %s3708_s15 }
 0x2e5   : > { %3538 = vrot.lane.b32.xlu2 %v3537_v8, %s3708_s15 }
 0x2e9   : > { %v1963_v38 = vld [vmem:[#allocation3] sm:$0xff] }
 0x2ea   : > { %v3547_v63 = vpack.i.bf16 %v1963_v38, %v1965_v45  ;;  %2073 = vmatpush.msrb.mxu1 %v1963_v38 }
 0x2eb   : > { %3064 = vmatmul.msk.f32.vlgmr.msrb.gmra.mxu1 %vm1999_vm2, %v1961_v53  ;;  %3067 = vmatmul.msk.f32.gmra.mxu2 %vm1999_vm2, %v1962_v27 }
 0x2ec   : > { %3553 = vrot.lane.b32.xlu0 %v3542_v6, %s3702_s28  ;;  %3548 = vrot.lane.b32.xlu1 %v3547_v63, %s3708_s15  ;;  %s3123_s15 = smul.u32 80, %s4885_s30 }
 0x2ed   : > { %3558 = vrot.lane.b32.xlu2 %v3537_v8, %s3702_s28 }
 0x2ee   : > { %s4834_s18 = scalar_lea.vmem %s4879_s9, %s3123_s15 }
 0x2f3   : > { %3065 = vmatmul.msk.f32.gmra.mxu1 %vm1999_vm2, %v1962_v27 }
 0x2f4   : > { %3568 = vrot.lane.b32.xlu0 %v3547_v63, %s3701_s27  ;;  %3573 = vrot.lane.b32.xlu1 %v3537_v8, %s3701_s27 }
 0x2f5   : > { %3563 = vrot.lane.b32.xlu2 %v3542_v6, %s3701_s27 }
 0x2fc   : > { %3583 = vrot.lane.b32.xlu0 %v3582_v2, %s3701_s27  ;;  %3578 = vrot.lane.b32.xlu1 %v3547_v63, %s3702_s28 }
 0x2fd   : > { %3588 = vrot.lane.b32.xlu2 %v3587_v15, %s3701_s27 }
 0x304   : > { %3598 = vrot.lane.b32.xlu0 %v3547_v63, %s3709_s16  ;;  %3603 = vrot.lane.b32.xlu1 %v3537_v8, %s3709_s16 }
 0x305   : > { %3593 = vrot.lane.b32.xlu2 %v3542_v6, %s3709_s16 }
 0x30c   : > { %3618 = vrot.lane.b32.xlu0 %v3542_v6, %s3710_s17  ;;  %3608 = vrot.lane.b32.xlu1 %v3607_v25, %s3701_s27 }
 0x30d   : > { %3613 = vrot.lane.b32.xlu2 %v3537_v8, %s3710_s17 }
 0x314   : > { %3628 = vrot.lane.b32.xlu0 %v3607_v25, %s3710_s17  ;;  %3633 = vrot.lane.b32.xlu1 %v3587_v15, %s3710_s17  ;;  %v3086_v15 = vld [vmem:[%s4873_s3 + $0x70] sm:$0xff] }
 0x315   : > { %3623 = vrot.lane.b32.xlu2 %v3582_v2, %s3710_s17  ;;  %v3069_v2 = vld [vmem:[%s4873_s3 + $0x68] sm:$0xff] }
 0x31c   : > { %2683 = vperm.xlu0 %3536, %v2679_v35   ;;  %3638 = vrot.lane.b32.xlu1 %v3547_v63, %s3710_s17 }
 0x31d   : > { %2688 = vperm.xlu2 %3535, %v2680_v36  }
 0x33f   : > { %v3539_v5 = vpop.permute.xlu2 %3538 }
 0x340   : > { %v3541_v10 = vunpack.i.h.bf16 %v3539_v5  ;;  %v3540_v42 = vunpack.i.l.bf16 %v3539_v5 }
 0x342   : > { %v1994_v26 = vsel %vm1990_vm4, %v3540_v42, %v3541_v10 }
 0x343   : > { %2043 = vmatpush.msrb.mxu0 %v1994_v26 }
 0x347   : > { %v4656_v56 = vpop.permute.xlu2 %3558 }
 0x348   : > { %v3561_v58 = vunpack.i.h.bf16 %v4656_v56  ;;  %v3560_v59 = vunpack.i.l.bf16 %v4656_v56 }
 0x34a   : > { %v2204_v23 = vsel %vm1314_vm13, %v3560_v59, %v3561_v58 }
 0x34b   : > { %2252 = vmatpush.msra.mxu2 %v2204_v23  ;;  %v3087_v23 = vld [vmem:[%s4873_s3 + $0x78] sm:$0xff] }
 0x34f   : > { %v3564_v61 = vpop.permute.xlu2 %3563 }
 0x350   : > { %v3566_v1 = vunpack.i.h.bf16 %v3564_v61  ;;  %v3565_v29 = vunpack.i.l.bf16 %v3564_v61 }
 0x352   : > { %v2274_v45 = vsel %vm1179_vm11, %v3565_v29, %v3566_v1 }
 0x356   : > { %v3544_v40 = vpop.permute.xlu0 %3543 }
 0x357   : > { %v3546_v62 = vunpack.i.h.bf16 %v3544_v40  ;;  %v3545_v48 = vunpack.i.l.bf16 %v3544_v40  ;;  %v4663_v12 = vpop.permute.xlu2 %3588 }
 0x358   : > { %v3591_v43 = vunpack.i.h.bf16 %v4663_v12  ;;  %v3590_v13 = vunpack.i.l.bf16 %v4663_v12 }
 0x359   : > { %v1992_v50 = vsel %vm1990_vm4, %v3545_v48, %v3546_v62 }
 0x35a   : > { %2044 = vmatpush.msrb.mxu0 %v1992_v50  ;;  %v2363_v41 = vsel %vm1179_vm11, %v3590_v13, %v3591_v43 }
 0x35b   : > { %3062 = vmatmul.msk.f32.vlgmr.msrb.gmra.mxu0 %vm1999_vm2, %v3058_v7 }
 0x35c   : > { %2150 = vmatpush.msra.mxu0 %v4622_v24 }
 0x35e   : > { %v4673_v14 = vpop.permute.xlu0 %3553  ;;  %2151 = vmatpush.msra.mxu0 %v4611_v37  ;;  %v3549_v55 = vpop.permute.xlu1 %3548 }
 0x35f   : > { %v3556_v33 = vunpack.i.h.bf16 %v4673_v14  ;;  %v3555_v11 = vunpack.i.l.bf16 %v4673_v14  ;;  %v3551_v18 = vunpack.i.h.bf16 %v3549_v55  ;;  %v3550_v57 = vunpack.i.l.bf16 %v3549_v55  ;;  %v4681_v19 = vpop.permute.xlu2 %3593 }
 0x360   : > { %v3596_v5 = vunpack.i.h.bf16 %v4681_v19  ;;  %v3595_v27 = vunpack.i.l.bf16 %v4681_v19 }
 0x361   : > { %v2202_v21 = vsel %vm1314_vm13, %v3555_v11, %v3556_v33  ;;  %v1993_v46 = vsel %vm1990_vm4, %v3550_v57, %v3540_v42  ;;  %v1991_v54 = vsel %vm1990_vm4, %v3551_v18, %v3545_v48  ;;  %v3075_v18 = vld [vmem:[%s4873_s3 + $0x18] sm:$0xff]  ;;  %v3092_v57 = vld [vmem:[%s4873_s3 + $0x20] sm:$0xff] }
 0x362   : > { %2253 = vmatpush.msra.mxu2 %v2202_v21  ;;  %2020 = vmatpush.msrb.mxu3 %v1993_v46 }
 0x363   : > { %3063 = vmatmul.msk.f32.gmra.mxu0 %vm1999_vm2, %v3059_v3  ;;  %3080 = vmatmul.msk.f32.vlgmr.msra.gmra.mxu2 %vm1999_vm2, %v3076_v22 }
 0x364   : > { %2021 = vmatpush.msrb.mxu3 %v1991_v54  ;;  %2411 = vmatpush.msrb.mxu2 %v2363_v41 }
 0x365   : > { %3060 = vmatmul.msk.f32.vlgmr.msrb.gmra.mxu3 %vm1999_vm2, %v3058_v7 }
 0x366   : > { %v3569_v49 = vpop.permute.xlu0 %3568  ;;  %2127 = vmatpush.msra.mxu3 %v4605_v52  ;;  %v3574_v28 = vpop.permute.xlu1 %3573 }
 0x367   : > { %v3570_v9 = vunpack.i.l.bf16 %v3569_v49  ;;  %v3576_v17 = vunpack.i.h.bf16 %v3574_v28  ;;  %v3575_v47 = vunpack.i.l.bf16 %v3574_v28  ;;  %v3571_v51 = vunpack.i.h.bf16 %v3569_v49  ;;  %v4705_v44 = vpop.permute.xlu2 %3613  ;;  %v3094_v28 = vld [vmem:[%s4873_s3 + $0x50] sm:$0xff] }
 0x368   : > { %2128 = vmatpush.msra.mxu3 %v4614_v34  ;;  %v3616_v16 = vunpack.i.h.bf16 %v4705_v44  ;;  %v3615_v34 = vunpack.i.l.bf16 %v4705_v44  ;;  %v3105_v44 = vld [vmem:[%s4873_s3 + $0x88] sm:$0xff] }
 0x369   : > { %v2276_v20 = vsel %vm1179_vm11, %v3575_v47, %v3576_v17  ;;  %v2275_v52 = vsel %vm1179_vm11, %v3570_v9, %v3575_v47  ;;  %v2273_v37 = vsel %vm1179_vm11, %v3571_v51, %v3565_v29  ;;  %v3093_v9 = vld [vmem:[%s4873_s3 + $0x28] sm:$0xff] }
 0x36a   : > { %2324 = vmatpush.msrb.mxu0 %v2276_v20  ;;  %2301 = vmatpush.msrb.mxu3 %v2275_v52  ;;  %v2523_v35 = vsel %vm2519_vm5, %v3615_v34, %v3616_v16  ;;  %v3095_v52 = vld [vmem:[%s4873_s3 + $0x58] sm:$0xff]  ;;  %v3104_v16 = vld [vmem:[%s4873_s3 + $0x80] sm:$0xff] }
 0x36b   : > { %3072 = vmatmul.msk.f32.vlgmr.msra.gmra.mxu0 %vm1999_vm2, %v3068_v32  ;;  %3081 = vmatmul.msk.f32.gmra.mxu2 %vm1999_vm2, %v3077_v31 }
 0x36c   : > { %2325 = vmatpush.msrb.mxu0 %v2274_v45  ;;  %2302 = vmatpush.msrb.mxu3 %v2273_v37 }
 0x36d   : > { %3061 = vmatmul.msk.f32.gmra.mxu3 %vm1999_vm2, %v3059_v3 }
 0x36e   : > { %v3584_v6 = vpop.permute.xlu0 %3583  ;;  %v3579_v24 = vpop.permute.xlu1 %3578 }
 0x36f   : > { %v3586_v8 = vunpack.i.h.bf16 %v3584_v6  ;;  %v3585_v38 = vunpack.i.l.bf16 %v3584_v6  ;;  %v3581_v63 = vunpack.i.h.bf16 %v3579_v24  ;;  %v3580_v0 = vunpack.i.l.bf16 %v3579_v24  ;;  %v3624_v21 = vpop.permute.xlu2 %3623  ;;  %v2098_v6 = vpop.f32.mrf.mxu2 }
 0x370   : > { %v3625_v54 = vunpack.i.l.bf16 %v3624_v21 }
 0x371   : > { %v2361_v4 = vsel %vm1179_vm11, %v3585_v38, %v3586_v8  ;;  %v2203_v25 = vsel %vm1314_vm13, %v3580_v0, %v3560_v59  ;;  %v2201_v36 = vsel %vm1314_vm13, %v3581_v63, %v3555_v11  ;;  %vm2446_vm13 = vcmask 457728   ;;  %v3074_v59 = vld [vmem:[%s4873_s3 + $0x10] sm:$0xff] }
 0x372   : > { %2412 = vmatpush.msrb.mxu2 %v2361_v4  ;;  %2229 = vmatpush.msra.mxu1 %v2203_v25  ;;  %v2448_v62 = vsel %vm2446_vm13, %v3595_v27, %v3596_v5 }
 0x373   : > { %3073 = vmatmul.msk.f32.gmra.mxu0 %vm1999_vm2, %v3069_v2  ;;  %3090 = vmatmul.msk.f32.vlgmr.msrb.gmra.mxu2 %vm1999_vm2, %v3086_v15 }
 0x374   : > { %2571 = vmatpush.msra.mxu2 %v2523_v35  ;;  %2230 = vmatpush.msra.mxu1 %v2201_v36 }
 0x375   : > { %3070 = vmatmul.msk.f32.vlgmr.msra.gmra.mxu3 %vm1999_vm2, %v3068_v32  ;;  %3078 = vmatmul.msk.f32.vlgmr.msra.gmra.mxu1 %vm1999_vm2, %v3076_v22  ;;  %v3626_v22 = vunpack.i.h.bf16 %v3624_v21 }
 0x376   : > { %v3599_v53 = vpop.permute.xlu0 %3598  ;;  %v3604_v10 = vpop.permute.xlu1 %3603 }
 0x377   : > { %v3600_v42 = vunpack.i.l.bf16 %v3599_v53  ;;  %v3606_v26 = vunpack.i.h.bf16 %v3604_v10  ;;  %v3605_v56 = vunpack.i.l.bf16 %v3604_v10  ;;  %v3601_v58 = vunpack.i.h.bf16 %v3599_v53  ;;  %v2101_v8 = vpop.f32.mrf.mxu2 }
 0x378   : > { %v2596_v47 = vsel %vm2519_vm5, %v3625_v54, %v3626_v22 }
 0x379   : > { %v2450_v61 = vsel %vm2446_vm13, %v3605_v56, %v3606_v26  ;;  %v2449_v40 = vsel %vm2446_vm13, %v3600_v42, %v3605_v56  ;;  %v2447_v48 = vsel %vm2446_vm13, %v3601_v58, %v3595_v27 }
 0x37a   : > { %2498 = vmatpush.msra.mxu0 %v2450_v61  ;;  %2475 = vmatpush.msra.mxu3 %v2449_v40 }
 0x37b   : > { %3084 = vmatmul.msk.f32.vlgmr.msrb.gmra.mxu0 %vm1999_vm2, %v3074_v59  ;;  %3091 = vmatmul.msk.f32.gmra.mxu2 %vm1999_vm2, %v3087_v23 }
 0x37c   : > { %2499 = vmatpush.msra.mxu0 %v2448_v62  ;;  %2476 = vmatpush.msra.mxu3 %v2447_v48  ;;  %v2164_v48 = vadd.s32 4294967292, %v4536_v39 }
 0x37d   : > { %3071 = vmatmul.msk.f32.gmra.mxu3 %vm1999_vm2, %v3069_v2  ;;  %3079 = vmatmul.msk.f32.gmra.mxu1 %vm1999_vm2, %v3077_v31 }
 0x37e   : > { %v3619_v7 = vpop.permute.xlu0 %3618  ;;  %v3609_v50 = vpop.permute.xlu1 %3608 }
 0x37f   : > { %v3621_v43 = vunpack.i.h.bf16 %v3619_v7  ;;  %v3620_v14 = vunpack.i.l.bf16 %v3619_v7  ;;  %v3611_v55 = vunpack.i.h.bf16 %v3609_v50  ;;  %v3610_v33 = vunpack.i.l.bf16 %v3609_v50 }
 0x380   : > { %v2660_v50 = vadd.s32 4, %v4536_v39 }
 0x381   : > { %v2521_v11 = vsel %vm2519_vm5, %v3620_v14, %v3621_v43  ;;  %v2362_v3 = vsel %vm1179_vm11, %v3610_v33, %v3590_v13  ;;  %v2360_v19 = vsel %vm1179_vm11, %v3611_v55, %v3585_v38  ;;  %v4795_v38 = vpop.f32.mrf.mxu1  ;;  %vm2166_vm11 = vcmp.ge.s32.totalorder %v2164_v48, 0 }
 0x382   : > { %2572 = vmatpush.msra.mxu2 %v2521_v11  ;;  %2388 = vmatpush.msrb.mxu1 %v2362_v3  ;;  %vm2664_vm6 = vcmp.lt.s32.totalorder %v2660_v50, 16 }
 0x383   : > { %3085 = vmatmul.msk.f32.gmra.mxu0 %vm1999_vm2, %v3075_v18  ;;  %3102 = vmatmul.msk.f32.vlgmr.msra.gmra.mxu2 %vm1999_vm2, %v3092_v57 }
 0x384   : > { %2389 = vmatpush.msrb.mxu1 %v2360_v19 }
 0x385   : > { %3082 = vmatmul.msk.f32.vlgmr.msrb.gmra.mxu3 %vm1999_vm2, %v3074_v59  ;;  %3088 = vmatmul.msk.f32.vlgmr.msrb.gmra.mxu1 %vm1999_vm2, %v3086_v15 }
 0x386   : > { %v3629_v46 = vpop.permute.xlu0 %3628  ;;  %v3634_v41 = vpop.permute.xlu1 %3633 }
 0x387   : > { %v3630_v12 = vunpack.i.l.bf16 %v3629_v46  ;;  %v3636_v13 = vunpack.i.h.bf16 %v3634_v41  ;;  %v3635_v49 = vunpack.i.l.bf16 %v3634_v41  ;;  %v3631_v1 = vunpack.i.h.bf16 %v3629_v46 }
 0x389   : > { %v2597_v29 = vsel %vm2519_vm5, %v3630_v12, %v3635_v49  ;;  %v2598_v17 = vsel %vm2519_vm5, %v3635_v49, %v3636_v13  ;;  %v2595_v51 = vsel %vm2519_vm5, %v3631_v1, %v3625_v54  ;;  %v4799_v2 = vpop.f32.mrf.mxu1  ;;  %v2710_v13 = vld [vmem:[%s4876_s6] sm:$0xf] }
 0x38a   : > { %2623 = vmatpush.msrb.mxu3 %v2597_v29  ;;  %2646 = vmatpush.msrb.mxu0 %v2598_v17 }
 0x38b   : > { %3098 = vmatmul.msk.f32.vlgmr.msra.gmra.mxu0 %vm1999_vm2, %v3094_v28  ;;  %3103 = vmatmul.msk.f32.gmra.mxu2 %vm1999_vm2, %v3093_v9 }
 0x38c   : > { %2624 = vmatpush.msrb.mxu3 %v2595_v51  ;;  %2647 = vmatpush.msrb.mxu0 %v2596_v47 }
 0x38d   : > { %3083 = vmatmul.msk.f32.gmra.mxu3 %vm1999_vm2, %v3075_v18  ;;  %3089 = vmatmul.msk.f32.gmra.mxu1 %vm1999_vm2, %v3087_v23 }
 0x38e   : > { %v3639_v32 = vpop.permute.xlu1 %3638  ;;  %2713 = vperm.xlu1 %3642, %v2710_v13   ;;  %v2816_v13 = vld [vmem:[%s3795_s21 + $0x38] sm:$0xff] }
 0x38f   : > { %v3641_v31 = vunpack.i.h.bf16 %v3639_v32  ;;  %v3640_v20 = vunpack.i.l.bf16 %v3639_v32  ;;  %v2684_v32 = vpop.permute.xlu0 %2683  ;;  %2824 = vst [vmem:[%s4834_s18 + $0x38] sm:$0xff] %v2816_v13 }
 0x391   : > { %v2522_v45 = vsel %vm2519_vm5, %v3640_v20, %v3615_v34  ;;  %v2520_v37 = vsel %vm2519_vm5, %v3641_v31, %v3620_v14 }
 0x392   : > { %2548 = vmatpush.msra.mxu1 %v2522_v45  ;;  %v2689_v45 = vpop.permute.xlu2 %2688 }
 0x393   : > { %3099 = vmatmul.msk.f32.gmra.mxu0 %vm1999_vm2, %v3095_v52 }
 0x394   : > { %2549 = vmatpush.msra.mxu1 %v2520_v37  ;;  %v2163_v37 = vadd.s32 4294967292, %v4526_v30 }
 0x395   : > { %3096 = vmatmul.msk.f32.vlgmr.msra.gmra.mxu3 %vm1999_vm2, %v3094_v28  ;;  %3100 = vmatmul.msk.f32.vlgmr.msra.gmra.mxu1 %vm1999_vm2, %v3092_v57 }
 0x396   : > { %vm2165_vm8 = vcmp.ge.s32.totalorder %v2163_v37, 0 }
 0x39b   : > { %3108 = vmatmul.msk.f32.vlgmr.msrb.gmra.mxu0 %vm1999_vm2, %v3104_v16 }
 0x39d   : > { %3097 = vmatmul.msk.f32.gmra.mxu3 %vm1999_vm2, %v3095_v52  ;;  %3101 = vmatmul.msk.f32.gmra.mxu1 %vm1999_vm2, %v3093_v9 }
 0x3a3   : > { %3109 = vmatmul.msk.f32.gmra.mxu0 %vm1999_vm2, %v3105_v44 }
 0x3a5   : > { %3106 = vmatmul.msk.f32.vlgmr.msrb.gmra.mxu3 %vm1999_vm2, %v3104_v16  ;;  %v2700_v16 = vstv %s3110_s25 }
 0x3ad   : > { %3107 = vmatmul.msk.f32.gmra.mxu3 %vm1999_vm2, %v3105_v44 }
 0x3d8   : > { %v2046_v34 = vpop.f32.mrf.mxu0 }
 0x3d9   : > { %v2099_v43 = vadd.f32 %v2098_v6, %v2046_v34  ;;  %v2659_v34 = vadd.s32 4, %v4526_v30 }
 0x3db   : > { %vm2663_vm10 = vcmp.lt.s32.totalorder %v2659_v34, 16 }
 0x3e0   : > { %v2049_v24 = vpop.f32.mrf.mxu0 }
 0x3e1   : > { %v2102_v21 = vadd.f32 %v2101_v8, %v2049_v24 }
 0x3e6   : > { %v2255_v4 = vpop.f32.mrf.mxu2 }
 0x3e8   : > { %v4797_v63 = vpop.f32.mrf.mxu3  ;;  %v2153_v0 = vpop.f32.mrf.mxu0 }
 0x3e9   : > { %v2160_v18 = vadd.f32 %v2153_v0, %v2099_v43  ;;  %v2076_v24 = vadd.f32 %v4795_v38, %v4797_v63  ;;  %v2709_v38 = vld [vmem:[%s4875_s5] sm:$0xf] }
 0x3eb   : > { %v2176_v46 = vsel %vm2166_vm11, %v2160_v18, 0.0 }
 0x3ee   : > { %v2258_v35 = vpop.f32.mrf.mxu2 }
 0x3f0   : > { %v4801_v15 = vpop.f32.mrf.mxu3  ;;  %v2156_v25 = vpop.f32.mrf.mxu0 }
 0x3f1   : > { %v2162_v41 = vadd.f32 %v2156_v25, %v2102_v21  ;;  %v2079_v30 = vadd.f32 %v4799_v2, %v4801_v15  ;;  %v2811_v21 = vld [vmem:[%s3795_s21 + $0x10] sm:$0xff] }
 0x3f2   : > { %v2232_v5 = vpop.f32.mrf.mxu1  ;;  %2819 = vst [vmem:[%s4834_s18 + $0x10] sm:$0xff] %v2811_v21 }
 0x3f3   : > { %v2178_v29 = vsel %vm2166_vm11, %v2162_v41, 0.0  ;;  %v2813_v41 = vld [vmem:[%s3795_s21 + $0x20] sm:$0xff] }
 0x3f4   : > { %2821 = vst [vmem:[%s4834_s18 + $0x20] sm:$0xff] %v2813_v41 }
 0x3f6   : > { %v2414_v10 = vpop.f32.mrf.mxu2 }
 0x3f8   : > { %v2130_v36 = vpop.f32.mrf.mxu3  ;;  %v2327_v53 = vpop.f32.mrf.mxu0 }
 0x3f9   : > { %v2328_v7 = vadd.f32 %v2327_v53, %v2255_v4 }
 0x3fa   : > { %v2235_v26 = vpop.f32.mrf.mxu1 }
 0x3fb   : > { %v2421_v3 = vadd.f32 %v2414_v10, %v2328_v7 }
 0x3fd   : > { %v2425_v39 = vadd.f32 %v2421_v3, %v2176_v46  ;;  %v2809_v3 = vld [vmem:[%s3795_s21] sm:$0xff]  ;;  %v2812_v46 = vld [vmem:[%s3795_s21 + $0x18] sm:$0xff] }
 0x3fe   : > { %v2417_v59 = vpop.f32.mrf.mxu2  ;;  %2817 = vst [vmem:[%s4834_s18] sm:$0xff] %v2809_v3 }
 0x3ff   : > { %2820 = vst [vmem:[%s4834_s18 + $0x18] sm:$0xff] %v2812_v46 }
 0x400   : > { %v4803_v42 = vpop.f32.mrf.mxu3  ;;  %v2330_v27 = vpop.f32.mrf.mxu0 }
 0x401   : > { %v2331_v19 = vadd.f32 %v2330_v27, %v2258_v35  ;;  %v2159_v35 = vadd.f32 %v2130_v36, %v2076_v24  ;;  %v2161_v36 = vadd.f32 %v4803_v42, %v2079_v30  ;;  %v2714_v18 = vpop.permute.xlu1 %2713 }
 0x402   : > { %v2391_v23 = vpop.f32.mrf.mxu1 }
 0x403   : > { %v2423_v54 = vadd.f32 %v2417_v59, %v2331_v19  ;;  %v2810_v19 = vld [vmem:[%s3795_s21 + $0x8] sm:$0xff] }
 0x404   : > { %2818 = vst [vmem:[%s4834_s18 + $0x8] sm:$0xff] %v2810_v19 }
 0x405   : > { %v2427_v47 = vadd.f32 %v2423_v54, %v2178_v29  ;;  %v2815_v54 = vld [vmem:[%s3795_s21 + $0x30] sm:$0xff] }
 0x406   : > { %v2574_v62 = vpop.f32.mrf.mxu2  ;;  %2823 = vst [vmem:[%s4834_s18 + $0x30] sm:$0xff] %v2815_v54 }
 0x408   : > { %v2304_v56 = vpop.f32.mrf.mxu3  ;;  %v2501_v58 = vpop.f32.mrf.mxu0 }
 0x409   : > { %v2575_v55 = vadd.f32 %v2574_v62, %v2501_v58  ;;  %v2305_v44 = vadd.f32 %v2304_v56, %v2232_v5  ;;  %v2175_v56 = vsel %vm2165_vm8, %v2159_v35, 0.0 }
 0x40a   : > { %v2394_v14 = vpop.f32.mrf.mxu1 }
 0x40b   : > { %v2420_v10 = vadd.f32 %v2391_v23, %v2305_v44 }
 0x40e   : > { %v2577_v22 = vpop.f32.mrf.mxu2 }
 0x410   : > { %v2307_v61 = vpop.f32.mrf.mxu3  ;;  %v2504_v40 = vpop.f32.mrf.mxu0 }
 0x411   : > { %v2578_v49 = vadd.f32 %v2577_v22, %v2504_v40  ;;  %v2308_v27 = vadd.f32 %v2307_v61, %v2235_v26  ;;  %v2424_v26 = vadd.f32 %v2420_v10, %v2175_v56  ;;  %v2177_v40 = vsel %vm2165_vm8, %v2161_v36, 0.0 }
 0x412   : > { %v2551_v51 = vpop.f32.mrf.mxu1 }
 0x413   : > { %v2422_v23 = vadd.f32 %v2394_v14, %v2308_v27 }
 0x415   : > { %v2426_v48 = vadd.f32 %v2422_v23, %v2177_v40 }
 0x418   : > { %v2478_v33 = vpop.f32.mrf.mxu3  ;;  %v2649_v11 = vpop.f32.mrf.mxu0 }
 0x419   : > { %v2656_v57 = vadd.f32 %v2649_v11, %v2575_v55  ;;  %v2552_v8 = vadd.f32 %v2551_v51, %v2478_v33 }
 0x41a   : > { %v2554_v63 = vpop.f32.mrf.mxu1 }
 0x41b   : > { %v2672_v12 = vsel %vm2664_vm6, %v2656_v57, 0.0 }
 0x41c   : > { %v2676_v28 = vadd.f32 %v2672_v12, %v2425_v39  ;;  %v2814_v39 = vld [vmem:[%s3795_s21 + $0x28] sm:$0xff]  ;;  %s3118_s21 = sshll.u32 %s4885_s30, 3 }
 0x41d   : > { %2822 = vst [vmem:[%s4834_s18 + $0x28] sm:$0xff] %v2814_v39  ;;  %s398_s20 = scalar_lea.vmem %s4878_s8, %s3118_s21 }
 0x41e   : > { %v2692_v20 = vadd.f32 %v2684_v32, %v2676_v28 }
 0x420   : > { %v2481_v1 = vpop.f32.mrf.mxu3  ;;  %v2652_v9 = vpop.f32.mrf.mxu0  ;;  %v2702_v25 = vmul.f32 %v2700_v16, %v2692_v20  ;;  %vm2697_vm9 = vcmp.ge.f32.partialorder %v2692_v20, 0.0 }
 0x421   : > { %v2658_v17 = vadd.f32 %v2652_v9, %v2578_v49  ;;  %v2555_v61 = vadd.f32 %v2554_v63, %v2481_v1 }
 0x422   : > { %v2706_v5 = vsel %vm2697_vm9, %v2692_v20, %v2702_v25  ;;  %v2760_v20 = vshrl.u32 %v496_v60, 7 }
 0x423   : > { %v2674_v31 = vsel %vm2664_vm6, %v2658_v17, 0.0  ;;  %vm2805_vm6 = vcmask 1043456  }
 0x424   : > { %v2678_v52 = vadd.f32 %v2674_v31, %v2427_v47  ;;  %vm2761_vm1 = vcmp.lt.s32.totalorder %v2760_v20, 2 }
 0x426   : > { %v2694_v6 = vadd.f32 %v2689_v45, %v2678_v52 }
 0x428   : > { %v2626_v0 = vpop.f32.mrf.mxu3  ;;  %vm2699_vm7 = vcmp.ge.f32.partialorder %v2694_v6, 0.0  ;;  %v2704_v4 = vmul.f32 %v2700_v16, %v2694_v6 }
 0x429   : > { %v2655_v53 = vadd.f32 %v2626_v0, %v2552_v8 }
 0x42a   : > { %v2708_v58 = vsel %vm2699_vm7, %v2694_v6, %v2704_v4 }
 0x42b   : > { %2753 = vmatpush.msrb.mxu2 %v2708_v58  ;;  %v2671_v59 = vsel %vm2663_vm10, %v2655_v53, 0.0 }
 0x42c   : > { %v2675_v2 = vadd.f32 %v2671_v59, %v2424_v26 }
 0x42d   : > { %2754 = vmatpush.msrb.mxu2 %v2706_v5 }
 0x42e   : > { %3112 = vmatmul.msk.f32.vlgmr.msrb.gmra.mxu2 %vm1999_vm2, %v2709_v38  ;;  %v2691_v50 = vadd.f32 %v2684_v32, %v2675_v2 }
 0x430   : > { %v2629_v15 = vpop.f32.mrf.mxu3  ;;  %v2701_v55 = vmul.f32 %v2700_v16, %v2691_v50  ;;  %vm2696_vm14 = vcmp.ge.f32.partialorder %v2691_v50, 0.0 }
 0x431   : > { %v2657_v62 = vadd.f32 %v2629_v15, %v2555_v61 }
 0x432   : > { %v2705_v11 = vsel %vm2696_vm14, %v2691_v50, %v2701_v55 }
 0x433   : > { %v2673_v7 = vsel %vm2663_vm10, %v2657_v62, 0.0 }
 0x434   : > { %v2677_v42 = vadd.f32 %v2673_v7, %v2426_v48 }
 0x436   : > { %v2693_v43 = vadd.f32 %v2689_v45, %v2677_v42 }
 0x438   : > { %vm2698_vm12 = vcmp.ge.f32.partialorder %v2693_v43, 0.0  ;;  %v2703_v14 = vmul.f32 %v2700_v16, %v2693_v43 }
 0x43a   : > { %v2707_v33 = vsel %vm2698_vm12, %v2693_v43, %v2703_v14 }
 0x43b   : > { %2733 = vmatpush.msrb.mxu1 %v2707_v33 }
 0x43d   : > { %2734 = vmatpush.msrb.mxu1 %v2705_v11 }
 0x43e   : > { %3111 = vmatmul.msk.f32.vlgmr.msrb.gmra.mxu1 %vm1999_vm2, %v2709_v38 }
 0x4b1   : > { %v2756_v57 = vpop.f32.mrf.mxu2 }
 0x4b2   : > { %v2757_v22 = vadd.f32 %v2756_v57, %v2714_v18 }
 0x4b4   : > { %v3114_v12 = vmul.f32 -1.442695, %v2757_v22 }
 0x4b6   : > { %3643 = vpow2.f32 %v3114_v12 }
 0x4bb   : > { %v2736_v49 = vpop.f32.mrf.mxu1 }
 0x4bc   : > { %v3644_v1 = vpop.eup %3643  ;;  %v2737_v28 = vadd.f32 %v2736_v49, %v2714_v18 }
 0x4bd   : > { %v2769_v9 = vadd.f32 1.0, %v3644_v1 }
 0x4be   : > { %v3113_v29 = vmul.f32 -1.442695, %v2737_v28 }
 0x4bf   : > { %3645 = vrcp.f32 %v2769_v9  ;;  %v2796_v52 = vand.u32 2147483648, %v2769_v9  ;;  %vm2790_vm15 = vweird.f32 %v2769_v9  ;;  %v2794_v37 = vand.u32 2147483647, %v2769_v9 }
 0x4c0   : > { %3647 = vpow2.f32 %v3113_v29 }
 0x4c1   : > { %v2797_v44 = vor.u32 1.1754944e-38, %v2796_v52  ;;  %vm2795_vm2 = vcmp.eq.f32.partialorder %v2794_v37, 8.507059e+37 }
 0x4c5   : > { %v3646_v17 = vpop.eup %3645 }
 0x4c6   : > { %v3648_v47 = vpop.eup %3647  ;;  %v2786_v51 = vmul.f32 %v3646_v17, %v2769_v9  ;;  %vm2791_vm0 = vweird.f32 %v3646_v17 }
 0x4c7   : > { %v2768_v32 = vadd.f32 1.0, %v3648_v47  ;;  %vm2792_vm3 = vmor %vm2790_vm15, %vm2791_vm0 }
 0x4c8   : > { %v2787_v31 = vsub.f32 1.0, %v2786_v51 }
 0x4c9   : > { %3649 = vrcp.f32 %v2768_v32  ;;  %v2781_v4 = vand.u32 2147483648, %v2768_v32  ;;  %v2779_v35 = vand.u32 2147483647, %v2768_v32  ;;  %vm2775_vm5 = vweird.f32 %v2768_v32 }
 0x4ca   : > { %v2788_v45 = vmul.f32 %v3646_v17, %v2787_v31 }
 0x4cb   : > { %v2782_v10 = vor.u32 1.1754944e-38, %v2781_v4  ;;  %vm2780_vm11 = vcmp.eq.f32.partialorder %v2779_v35, 8.507059e+37 }
 0x4cc   : > { %v2789_v16 = vadd.f32 %v3646_v17, %v2788_v45 }
 0x4ce   : > { %v2793_v34 = vsel %vm2792_vm3, %v3646_v17, %v2789_v16 }
 0x4cf   : > { %v3650_v6 = vpop.eup %3649  ;;  %v2798_v24 = vsel %vm2795_vm2, %v2797_v44, %v2793_v34 }
 0x4d0   : > { %v2801_v8 = vsel %vm2761_vm1, %v2798_v24, %v2757_v22  ;;  %v2771_v0 = vmul.f32 %v3650_v6, %v2768_v32  ;;  %vm2776_vm4 = vweird.f32 %v3650_v6 }
 0x4d1   : > { %2826 = vst [vmem:[%s4834_s18 + $0x48] sm:$0xf] %v2801_v8  ;;  %vm2777_vm13 = vmor %vm2775_vm5, %vm2776_vm4  ;;  %v2804_v58 = vrot.slane %v2801_v8, 4 }
 0x4d2   : > { %v2772_v60 = vsub.f32 1.0, %v2771_v0 }
 0x4d4   : > { %v2773_v25 = vmul.f32 %v3650_v6, %v2772_v60 }
 0x4d6   : > { %v2774_v53 = vadd.f32 %v3650_v6, %v2773_v25 }
 0x4d8   : > { %v2778_v27 = vsel %vm2777_vm13, %v3650_v6, %v2774_v53 }
 0x4d9   : > { %v2783_v30 = vsel %vm2780_vm11, %v2782_v10, %v2778_v27 }
 0x4da   : > { %v2800_v38 = vsel %vm2761_vm1, %v2783_v30, %v2737_v28 }
 0x4db   : > { %v2806_v63 = vsel %vm2805_vm6, %v2800_v38, %v2804_v58  ;;  %2825 = vst [vmem:[%s4834_s18 + $0x40] sm:$0xf] %v2800_v38 }
 0x4dc   : > { %2808 = vst [vmem:[%s398_s20] sm:$0xff] %v2806_v63 }
 0x4dd PF: > { %s21_s11 = sadd.s32 1, %s3692_s11   ;;  %s4880_s30 = smov %s3688_s10 }
 0x4de   : > { %p18_p8 = scmp.ge.s32.totalorder %s21_s11, 4   ;;  %s4881_s10 = smov %s4883_s13 }
 0x4e0   :  { %20 = sbr.rel (!%p18_p8) target bundleno = 2 (0x2), region = 119 }
 0x4e5   :  { %2882 = vsyncpa [#allocation5], 1 }
 0x4e6   :  { %2884 = vsyncpa [#allocation5 + $0x1], 1 }

</bundles_post_ra>
